<compile_context>
chip_gen: v7x
topology: tpu7x:2x2x1
jax: 0.10.0
libtpu: 0.0.40
codegen_flags: <defaults>
</compile_context>

<pallas_src>
import functools
import math

import jax
import jax.numpy as jnp
from jax.experimental import pallas as pl
from jax.experimental.pallas import tpu as pltpu


_VMEM_LIMIT = 48 * 1024 * 1024  # explicit scoped-VMEM cap (fits v7x's 64 MiB)


# ------------------------------ tiling helper ------------------------------ #
def _pick_tile(dim, desired, align):
    """Largest tile <= desired that divides dim and respects `align`, else full dim."""
    if dim <= desired:
        return dim
    t = desired
    while t >= align:
        if dim % t == 0 and t % align == 0:
            return t
        t //= 2
    return dim


def _apply_act(y, act):
    if act == "gelu":
        # TODO(synk): HF BERT's default is exact (erf) gelu; the tanh
        # approximation is used here (EUP-friendly on all TPU gens).
        return jax.nn.gelu(y, approximate=True)
    if act == "tanh":
        return jnp.tanh(y)
    return y


# ------------------------------ dense kernels ------------------------------ #
def _make_dense_fullk_kernel(act):
    # Single K step: no accumulator scratch, no pl.when branches.
    def kernel(x_ref, w_ref, b_ref, o_ref):
        y = jnp.dot(x_ref[...], w_ref[...], preferred_element_type=jnp.float32)
        y = _apply_act(y + b_ref[...], act)
        o_ref[...] = y.astype(o_ref.dtype)
    return kernel


def _make_dense_ktiled_kernel(act):
    # K-pipelined path with resident f32 accumulator (only for very large K).
    def kernel(x_ref, w_ref, b_ref, o_ref, acc_ref):
        @pl.when(pl.program_id(2) == 0)
        def _():
            acc_ref[...] = jnp.zeros_like(acc_ref)

        acc_ref[...] += jnp.dot(x_ref[...], w_ref[...],
                                preferred_element_type=jnp.float32)

        @pl.when(pl.program_id(2) == pl.num_programs(2) - 1)
        def _():
            y = _apply_act(acc_ref[...] + b_ref[...], act)
            o_ref[...] = y.astype(o_ref.dtype)
    return kernel


def dense(x, w, b, act=None, out_dtype=jnp.bfloat16, tm=512, tn=512, max_tk=4096):
    """y = act(x @ w + b).  Full-K single-step matmul when K <= max_tk."""
    M, K = x.shape
    N = w.shape[1]
    tm = _pick_tile(M, tm, 8)
    tn = _pick_tile(N, tn, 128)
    tk = _pick_tile(K, max_tk, 128)
    b2d = b.reshape(1, N)

    if tk == K:
        return pl.pallas_call(
            _make_dense_fullk_kernel(act),
            out_shape=jax.ShapeDtypeStruct((M, N), out_dtype),
            grid=(M // tm, N // tn),
            in_specs=[pl.BlockSpec((tm, K), lambda i, j: (i, 0)),
                      pl.BlockSpec((K, tn), lambda i, j: (0, j)),
                      pl.BlockSpec((1, tn), lambda i, j: (0, j))],
            out_specs=pl.BlockSpec((tm, tn), lambda i, j: (i, j)),
            compiler_params=pltpu.CompilerParams(
                dimension_semantics=("parallel", "parallel"),
                vmem_limit_bytes=_VMEM_LIMIT),
        )(x, w, b2d)

    return pl.pallas_call(
        _make_dense_ktiled_kernel(act),
        out_shape=jax.ShapeDtypeStruct((M, N), out_dtype),
        grid_spec=pltpu.PrefetchScalarGridSpec(
            num_scalar_prefetch=0,
            grid=(M // tm, N // tn, K // tk),
            in_specs=[pl.BlockSpec((tm, tk), lambda i, j, k: (i, k)),
                      pl.BlockSpec((tk, tn), lambda i, j, k: (k, j)),
                      pl.BlockSpec((1, tn), lambda i, j, k: (0, j))],
            out_specs=pl.BlockSpec((tm, tn), lambda i, j, k: (i, j)),
            scratch_shapes=[pltpu.VMEM((tm, tn), jnp.float32)]),
        compiler_params=pltpu.CompilerParams(
            dimension_semantics=("parallel", "parallel", "arbitrary"),
            vmem_limit_bytes=_VMEM_LIMIT),
    )(x, w, b2d)


# --------------------------- layernorm kernels ------------------------------ #
def _ln_kernel(x_ref, g_ref, b_ref, o_ref):
    x = x_ref[...].astype(jnp.float32)
    mu = jnp.mean(x, axis=-1, keepdims=True)
    var = jnp.mean(jnp.square(x - mu), axis=-1, keepdims=True)
    y = (x - mu) * jax.lax.rsqrt(var + 1e-12) * g_ref[...] + b_ref[...]
    o_ref[...] = y.astype(o_ref.dtype)


def _ln_res_kernel(x_ref, r_ref, g_ref, b_ref, o_ref):
    # Residual add fused into the layernorm: one fewer HBM round trip.
    x = x_ref[...].astype(jnp.float32) + r_ref[...].astype(jnp.float32)
    mu = jnp.mean(x, axis=-1, keepdims=True)
    var = jnp.mean(jnp.square(x - mu), axis=-1, keepdims=True)
    y = (x - mu) * jax.lax.rsqrt(var + 1e-12) * g_ref[...] + b_ref[...]
    o_ref[...] = y.astype(o_ref.dtype)


def layernorm(x, g, b, residual=None, out_dtype=jnp.bfloat16, tm=1024):
    M, H = x.shape
    tm = _pick_tile(M, tm, 8)
    row_spec = pl.BlockSpec((tm, H), lambda i: (i, 0))
    vec_spec = pl.BlockSpec((1, H), lambda i: (0, 0))
    if residual is None:
        kernel = _ln_kernel
        ins = (x, g.reshape(1, H), b.reshape(1, H))
        in_specs = [row_spec, vec_spec, vec_spec]
    else:
        kernel = _ln_res_kernel
        ins = (x, residual, g.reshape(1, H), b.reshape(1, H))
        in_specs = [row_spec, row_spec, vec_spec, vec_spec]
    return pl.pallas_call(
        kernel,
        out_shape=jax.ShapeDtypeStruct((M, H), out_dtype),
        grid=(M // tm,),
        in_specs=in_specs,
        out_specs=row_spec,
        compiler_params=pltpu.CompilerParams(
            dimension_semantics=("parallel",), vmem_limit_bytes=_VMEM_LIMIT),
    )(*ins)


# ----------- flash-style masked attention with fused output proj ------------ #
def _make_flash_attn_kernel(scale, num_heads, head_dim):
    def kernel(q_ref, k_ref, v_ref, bias_ref, wo_ref, bo_ref, o_ref,
               m_sc, l_sc, acc_sc):
        ki = pl.program_id(2)

        @pl.when(ki == 0)
        def _():
            m_sc[...] = jnp.full_like(m_sc, -1e30)
            l_sc[...] = jnp.zeros_like(l_sc)
            acc_sc[...] = jnp.zeros_like(acc_sc)

        q = q_ref[0]                        # (tq, nH, dh) bf16
        k = k_ref[0]                        # (tk, nH, dh) bf16
        v = v_ref[0]                        # (tk, nH, dh) bf16
        bias = bias_ref[0]                  # (1, tk) f32, 0 keep / -1e9 pad

        # Per-head scores for this (q-tile, k-tile); f32 accumulation on MXU.
        s = jnp.einsum('qhd,khd->hqk', q, k,
                       preferred_element_type=jnp.float32) * scale
        s = s + bias                        # broadcast (1,tk) -> (nH,tq,tk)

        m_prev = m_sc[...]
        m_new = jnp.maximum(m_prev, jnp.max(s, axis=-1, keepdims=True))
        alpha = jnp.exp(m_prev - m_new)
        p = jnp.exp(s - m_new)
        l_sc[...] = alpha * l_sc[...] + jnp.sum(p, axis=-1, keepdims=True)
        acc_sc[...] = alpha * acc_sc[...] + jnp.einsum(
            'hqk,khd->hqd', p.astype(v.dtype), v,
            preferred_element_type=jnp.float32)
        m_sc[...] = m_new

        @pl.when(ki == pl.num_programs(2) - 1)
        def _():
            denom = jnp.maximum(l_sc[...], 1e-30)     # guard all-padded rows
            # Softmax denominator via approx reciprocal -> EUP slot.
            ctx = acc_sc[...] * pl.reciprocal(denom, approx=True)  # (nH,tq,dh)
            ctx = jnp.transpose(ctx, (1, 0, 2)).reshape(
                ctx.shape[1], num_heads * head_dim)                # (tq, H)
            # Fused output projection: one K=H matmul (MXU-depth friendly).
            out = jnp.dot(ctx.astype(wo_ref.dtype), wo_ref[...],
                          preferred_element_type=jnp.float32) + bo_ref[...]
            o_ref[...] = out[None].astype(o_ref.dtype)
    return kernel


def attention(q, k, v, mask_bias, wo, bo, tq=128, tk=128):
    """q/k/v: [B, S, nH, dh] bf16; mask_bias: [B, 1, S] f32 (0 keep, -1e9 pad);
    wo: [H, H] bf16; bo: [H] f32.  Returns softmax(qk^T)v @ Wo + bo: [B, S, H].
    Flash-style: scores live only as (nH, tq, tk) tiles, never nH x S x S.
    """
    B, S, nH, dh = q.shape
    H = nH * dh
    scale = 1.0 / math.sqrt(dh)
    tq = _pick_tile(S, tq, 8)
    tk = _pick_tile(S, tk, 128)

    qkv_spec_q = pl.BlockSpec((1, tq, nH, dh), lambda b, qi, ki: (b, qi, 0, 0))
    qkv_spec_k = pl.BlockSpec((1, tk, nH, dh), lambda b, qi, ki: (b, ki, 0, 0))

    return pl.pallas_call(
        _make_flash_attn_kernel(scale, nH, dh),
        out_shape=jax.ShapeDtypeStruct((B, S, H), jnp.bfloat16),
        grid_spec=pltpu.PrefetchScalarGridSpec(
            num_scalar_prefetch=0,
            grid=(B, S // tq, S // tk),
            in_specs=[qkv_spec_q, qkv_spec_k, qkv_spec_k,
                      pl.BlockSpec((1, 1, tk), lambda b, qi, ki: (b, 0, ki)),
                      pl.BlockSpec((H, H), lambda b, qi, ki: (0, 0)),
                      pl.BlockSpec((1, H), lambda b, qi, ki: (0, 0))],
            out_specs=pl.BlockSpec((1, tq, H), lambda b, qi, ki: (b, qi, 0)),
            scratch_shapes=[pltpu.VMEM((nH, tq, 1), jnp.float32),
                            pltpu.VMEM((nH, tq, 1), jnp.float32),
                            pltpu.VMEM((nH, tq, dh), jnp.float32)]),
        compiler_params=pltpu.CompilerParams(
            dimension_semantics=("parallel", "parallel", "arbitrary"),
            vmem_limit_bytes=_VMEM_LIMIT),
    )(q, k, v, mask_bias, wo, bo.reshape(1, H))


# ------------- fused pooler + classifier head (single launch) --------------- #
def _head_kernel(cls_ref, wp_ref, bp_ref, wc_ref, bc_ref, o_ref):
    pooled = jnp.tanh(
        jnp.dot(cls_ref[...], wp_ref[...], preferred_element_type=jnp.float32)
        + bp_ref[...])
    logits = jnp.dot(pooled.astype(wc_ref.dtype), wc_ref[...],
                     preferred_element_type=jnp.float32) + bc_ref[...]
    o_ref[...] = logits


def classifier_head(cls, wp, bp, wc, bc):
    """BERT pooler (tanh) + classifier fused in one tiny kernel."""
    B, H = cls.shape
    num_labels = wc.shape[1]
    # Sublane-pad M (B is tiny) and lane-pad num_labels to 128 so stores are
    # unmasked / lane-dense; strip padding afterwards.
    Mp = max(8, -(-B // 8) * 8)
    Np = 128
    cls_p = jnp.zeros((Mp, H), cls.dtype).at[:B].set(cls)
    wc_p = jnp.zeros((H, Np), wc.dtype).at[:, :num_labels].set(wc)
    bc_p = jnp.zeros((1, Np), jnp.float32).at[0, :num_labels].set(bc)
    logits = pl.pallas_call(
        _head_kernel,
        out_shape=jax.ShapeDtypeStruct((Mp, Np), jnp.float32),
        grid=(1,),
        in_specs=[pl.BlockSpec((Mp, H), lambda i: (0, 0)),
                  pl.BlockSpec((H, H), lambda i: (0, 0)),
                  pl.BlockSpec((1, H), lambda i: (0, 0)),
                  pl.BlockSpec((H, Np), lambda i: (0, 0)),
                  pl.BlockSpec((1, Np), lambda i: (0, 0))],
        out_specs=pl.BlockSpec((Mp, Np), lambda i: (0, 0)),
        compiler_params=pltpu.CompilerParams(vmem_limit_bytes=_VMEM_LIMIT),
    )(cls_p, wp, bp.reshape(1, H), wc_p, bc_p)
    return logits[:B, :num_labels]


# ------------------------------ parameter init ------------------------------ #
def init_params(key, vocab, max_pos, H, nH, ffn, num_labels):
    ks = jax.random.split(key, 10)
    std = 0.02
    f32, bf16 = jnp.float32, jnp.bfloat16
    rnd = lambda k, shape: jax.random.normal(k, shape, f32) * std
    p = {}
    p["word_emb"] = rnd(ks[0], (vocab, H))
    p["pos_emb"] = rnd(ks[1], (max_pos, H))
    p["ln0_g"], p["ln0_b"] = jnp.ones((H,), f32), jnp.zeros((H,), f32)
    p["Wq"], p["bq"] = rnd(ks[2], (H, H)).astype(bf16), jnp.zeros((H,), f32)
    p["Wk"], p["bk"] = rnd(ks[3], (H, H)).astype(bf16), jnp.zeros((H,), f32)
    p["Wv"], p["bv"] = rnd(ks[4], (H, H)).astype(bf16), jnp.zeros((H,), f32)
    p["Wo"], p["bo"] = rnd(ks[5], (H, H)).astype(bf16), jnp.zeros((H,), f32)
    p["ln1_g"], p["ln1_b"] = jnp.ones((H,), f32), jnp.zeros((H,), f32)
    p["W1"], p["b1"] = rnd(ks[6], (H, ffn)).astype(bf16), jnp.zeros((ffn,), f32)
    p["W2"], p["b2"] = rnd(ks[7], (ffn, H)).astype(bf16), jnp.zeros((H,), f32)
    p["ln2_g"], p["ln2_b"] = jnp.ones((H,), f32), jnp.zeros((H,), f32)
    p["Wp"], p["bp"] = rnd(ks[8], (H, H)).astype(bf16), jnp.zeros((H,), f32)
    p["Wc"], p["bc"] = (rnd(ks[9], (H, num_labels)).astype(bf16),
                        jnp.zeros((num_labels,), f32))
    return p


# ------------------------------- forward pass ------------------------------- #
def sentiment_forward(params, input_ids, attention_mask, nH):
    # TODO(synk): the PyTorch module loads pretrained HF weights + a tokenizer;
    # weights here are synthetic (deterministic init), tokenization out of scope.
    B, S = input_ids.shape
    H = params["word_emb"].shape[1]
    dh = H // nH

    # Embeddings (gather is glue, plain JAX) + embedding layernorm.
    emb = params["word_emb"][input_ids] + params["pos_emb"][:S][None, :, :]
    x = layernorm(emb.reshape(B * S, H), params["ln0_g"], params["ln0_b"])   # bf16

    # --- self-attention block ---
    # Three projections; [B*S, H] -> [B, S, nH, dh] is a free reshape, so no
    # XLA-side head-major relayout of the big activation.
    q = dense(x, params["Wq"], params["bq"]).reshape(B, S, nH, dh)
    k = dense(x, params["Wk"], params["bk"]).reshape(B, S, nH, dh)
    v = dense(x, params["Wv"], params["bv"]).reshape(B, S, nH, dh)
    # Additive mask bias precomputed once in the wrapper (0 keep, -1e9 pad).
    mask_bias = ((attention_mask.astype(jnp.float32) - 1.0) * 1e9).reshape(B, 1, S)
    attn_out = attention(q, k, v, mask_bias, params["Wo"], params["bo"])  # [B,S,H]
    x = layernorm(attn_out.reshape(B * S, H), params["ln1_g"], params["ln1_b"],
                  residual=x)

    # --- feed-forward block ---
    h = dense(x, params["W1"], params["b1"], act="gelu")
    h = dense(h, params["W2"], params["b2"])
    x = layernorm(h, params["ln2_g"], params["ln2_b"], residual=x)

    # --- BERT-style pooler (CLS token) + classifier head (one fused kernel) ---
    cls = x.reshape(B, S, H)[:, 0, :]                              # [B, H]
    logits = classifier_head(cls, params["Wp"], params["bp"],
                             params["Wc"], params["bc"])
    return logits                                                   # [B, num_labels]


if __name__ == "__main__":
    B, S, H, nH, FFN = 2, 8, 32, 2, 64
    VOCAB, MAX_POS, NUM_LABELS = 64, 16, 2

    key = jax.random.PRNGKey(0)
    pkey, ikey = jax.random.split(key)
    params = init_params(pkey, VOCAB, MAX_POS, H, nH, FFN, NUM_LABELS)

    input_ids = jax.random.randint(ikey, (B, S), 0, VOCAB, dtype=jnp.int32)
    attention_mask = jnp.array([[1, 1, 1, 1, 1, 1, 1, 1],
                                [1, 1, 1, 1, 1, 1, 0, 0]], dtype=jnp.int32)

    fwd = jax.jit(functools.partial(sentiment_forward, nH=nH))
    logits = fwd(params, input_ids, attention_mask)
    jax.block_until_ready(logits)
    assert logits.shape == (B, NUM_LABELS)
    assert bool(jnp.all(jnp.isfinite(logits)))
    print("KERNEL_OK")
</pallas_src>

<mosaic_0001>
module attributes {stable_mosaic.version = 11 : i64} {
  func.func @kernel(%arg0: i32, %arg1: i32, %arg2: memref<16x32xbf16, #tpu.memory_space<vmem>>, %arg3: memref<32x32xbf16, #tpu.memory_space<vmem>>, %arg4: memref<1x32xf32, #tpu.memory_space<vmem>>, %arg5: memref<16x32xbf16, #tpu.memory_space<vmem>>) attributes {dimension_semantics = [#tpu.dimension_semantics<parallel>, #tpu.dimension_semantics<parallel>], iteration_bounds = array<i64: 1, 1>, scalar_prefetch = 0 : i64, scratch_operands = 0 : i64, tpu.core_type = #tpu.core_type<tc>, window_params = [{transform_indices = @transform_0, window_bounds = array<i64: 16, 32>}, {transform_indices = @transform_1, window_bounds = array<i64: 32, 32>}, {transform_indices = @transform_2, window_bounds = array<i64: 1, 32>}, {transform_indices = @transform_3, window_bounds = array<i64: 16, 32>}]} {
    %c0 = arith.constant 0 : index
    %c0_0 = arith.constant 0 : index
    %0 = vector.load %arg2[%c0, %c0_0] : memref<16x32xbf16, #tpu.memory_space<vmem>>, vector<16x32xbf16>
    %c0_1 = arith.constant 0 : index
    %c0_2 = arith.constant 0 : index
    %1 = vector.load %arg3[%c0_1, %c0_2] : memref<32x32xbf16, #tpu.memory_space<vmem>>, vector<32x32xbf16>
    %cst = arith.constant dense<0.000000e+00> : vector<16x32xf32>
    %2 = tpu.matmul %0, %1, %cst {dimension_numbers = #tpu.dot_dimension_numbers<[1], [0], [0], [1], [0, 0, 1, 1], [], []>} : vector<16x32xbf16>, vector<32x32xbf16>, vector<16x32xf32> -> vector<16x32xf32>
    %c0_3 = arith.constant 0 : index
    %c0_4 = arith.constant 0 : index
    %3 = vector.load %arg4[%c0_3, %c0_4] : memref<1x32xf32, #tpu.memory_space<vmem>>, vector<1x32xf32>
    %4 = vector.broadcast %3 : vector<1x32xf32> to vector<16x32xf32>
    %5 = arith.addf %2, %4 : vector<16x32xf32>
    %6 = arith.truncf %5 : vector<16x32xf32> to vector<16x32xbf16>
    %c0_5 = arith.constant 0 : index
    %c0_6 = arith.constant 0 : index
    %7 = vector.load %arg5[%c0_5, %c0_6] : memref<16x32xbf16, #tpu.memory_space<vmem>>, vector<16x32xbf16>
    tpu.vector_store %arg5[%c0_5, %c0_6], %6 {strides = array<i32>} : memref<16x32xbf16, #tpu.memory_space<vmem>>, vector<16x32xbf16>,
    return
  }
  func.func @transform_0(%arg0: i32, %arg1: i32) -> (i32, i32) {
    %c0_i32 = arith.constant 0 : i32
    %c0_i32_0 = arith.constant 0 : i32
    return %arg0, %c0_i32 : i32, i32
  }
  func.func @transform_1(%arg0: i32, %arg1: i32) -> (i32, i32) {
    %c0_i32 = arith.constant 0 : i32
    %c0_i32_0 = arith.constant 0 : i32
    return %c0_i32, %arg1 : i32, i32
  }
  func.func @transform_2(%arg0: i32, %arg1: i32) -> (i32, i32) {
    %c0_i32 = arith.constant 0 : i32
    %c0_i32_0 = arith.constant 0 : i32
    return %c0_i32, %arg1 : i32, i32
  }
  func.func @transform_3(%arg0: i32, %arg1: i32) -> (i32, i32) {
    %c0_i32 = arith.constant 0 : i32
    return %arg0, %arg1 : i32, i32
  }
}

module attributes {stable_mosaic.version = 11 : i64} {
  func.func @_ln_kernel(%arg0: i32, %arg1: memref<16x32xf32, #tpu.memory_space<vmem>>, %arg2: memref<1x32xf32, #tpu.memory_space<vmem>>, %arg3: memref<1x32xf32, #tpu.memory_space<vmem>>, %arg4: memref<16x32xbf16, #tpu.memory_space<vmem>>) attributes {dimension_semantics = [#tpu.dimension_semantics<parallel>], iteration_bounds = array<i64: 1>, scalar_prefetch = 0 : i64, scratch_operands = 0 : i64, tpu.core_type = #tpu.core_type<tc>, window_params = [{transform_indices = @transform_0, window_bounds = array<i64: 16, 32>}, {pipeline_mode = #tpu.pipeline_mode<synchronous>, transform_indices = @transform_1, window_bounds = array<i64: 1, 32>}, {pipeline_mode = #tpu.pipeline_mode<synchronous>, transform_indices = @transform_2, window_bounds = array<i64: 1, 32>}, {transform_indices = @transform_3, window_bounds = array<i64: 16, 32>}]} {
    %c0 = arith.constant 0 : index
    %c0_0 = arith.constant 0 : index
    %0 = vector.load %arg1[%c0, %c0_0] : memref<16x32xf32, #tpu.memory_space<vmem>>, vector<16x32xf32>
    %cst = arith.constant dense<0.000000e+00> : vector<16xf32>
    %1 = vector.multi_reduction <add>, %0, %cst [1] : vector<16x32xf32> to vector<16xf32>
    %2 = vector.shape_cast %1 : vector<16xf32> to vector<16x1xf32>
    %cst_1 = arith.constant 3.200000e+01 : f32
    %3 = vector.broadcast %cst_1 : f32 to vector<16x1xf32>
    %4 = arith.divf %2, %3 : vector<16x1xf32>
    %5 = vector.broadcast %4 : vector<16x1xf32> to vector<16x32xf32>
    %6 = arith.subf %0, %5 : vector<16x32xf32>
    %7 = arith.mulf %6, %6 : vector<16x32xf32>
    %cst_2 = arith.constant dense<0.000000e+00> : vector<16xf32>
    %8 = vector.multi_reduction <add>, %7, %cst_2 [1] : vector<16x32xf32> to vector<16xf32>
    %9 = vector.shape_cast %8 : vector<16xf32> to vector<16x1xf32>
    %cst_3 = arith.constant 3.200000e+01 : f32
    %10 = vector.broadcast %cst_3 : f32 to vector<16x1xf32>
    %11 = arith.divf %9, %10 : vector<16x1xf32>
    %12 = vector.broadcast %4 : vector<16x1xf32> to vector<16x32xf32>
    %13 = arith.subf %0, %12 : vector<16x32xf32>
    %cst_4 = arith.constant 9.99999996E-13 : f32
    %14 = vector.broadcast %cst_4 : f32 to vector<16x1xf32>
    %15 = arith.addf %11, %14 : vector<16x1xf32>
    %16 = math.rsqrt %15 : vector<16x1xf32>
    %17 = vector.broadcast %16 : vector<16x1xf32> to vector<16x32xf32>
    %18 = arith.mulf %13, %17 : vector<16x32xf32>
    %c0_5 = arith.constant 0 : index
    %c0_6 = arith.constant 0 : index
    %19 = vector.load %arg2[%c0_5, %c0_6] : memref<1x32xf32, #tpu.memory_space<vmem>>, vector<1x32xf32>
    %20 = vector.broadcast %19 : vector<1x32xf32> to vector<16x32xf32>
    %21 = arith.mulf %18, %20 : vector<16x32xf32>
    %c0_7 = arith.constant 0 : index
    %c0_8 = arith.constant 0 : index
    %22 = vector.load %arg3[%c0_7, %c0_8] : memref<1x32xf32, #tpu.memory_space<vmem>>, vector<1x32xf32>
    %23 = vector.broadcast %22 : vector<1x32xf32> to vector<16x32xf32>
    %24 = arith.addf %21, %23 : vector<16x32xf32>
    %25 = arith.truncf %24 : vector<16x32xf32> to vector<16x32xbf16>
    %c0_9 = arith.constant 0 : index
    %c0_10 = arith.constant 0 : index
    %26 = vector.load %arg4[%c0_9, %c0_10] : memref<16x32xbf16, #tpu.memory_space<vmem>>, vector<16x32xbf16>
    tpu.vector_store %arg4[%c0_9, %c0_10], %25 {strides = array<i32>} : memref<16x32xbf16, #tpu.memory_space<vmem>>, vector<16x32xbf16>,
    return
  }
  func.func @transform_0(%arg0: i32) -> (i32, i32) {
    %c0_i32 = arith.constant 0 : i32
    %c0_i32_0 = arith.constant 0 : i32
    return %arg0, %c0_i32 : i32, i32
  }
  func.func @transform_1(%arg0: i32) -> (i32, i32) {
    %c0_i32 = arith.constant 0 : i32
    %c0_i32_0 = arith.constant 0 : i32
    %c0_i32_1 = arith.constant 0 : i32
    return %c0_i32, %c0_i32_0 : i32, i32
  }
  func.func @transform_2(%arg0: i32) -> (i32, i32) {
    %c0_i32 = arith.constant 0 : i32
    %c0_i32_0 = arith.constant 0 : i32
    %c0_i32_1 = arith.constant 0 : i32
    return %c0_i32, %c0_i32_0 : i32, i32
  }
  func.func @transform_3(%arg0: i32) -> (i32, i32) {
    %c0_i32 = arith.constant 0 : i32
    %c0_i32_0 = arith.constant 0 : i32
    return %arg0, %c0_i32 : i32, i32
  }
}

module attributes {stable_mosaic.version = 11 : i64} {
  func.func @_ln_res_kernel(%arg0: i32, %arg1: memref<16x32xbf16, #tpu.memory_space<vmem>>, %arg2: memref<16x32xbf16, #tpu.memory_space<vmem>>, %arg3: memref<1x32xf32, #tpu.memory_space<vmem>>, %arg4: memref<1x32xf32, #tpu.memory_space<vmem>>, %arg5: memref<16x32xbf16, #tpu.memory_space<vmem>>) attributes {dimension_semantics = [#tpu.dimension_semantics<parallel>], iteration_bounds = array<i64: 1>, scalar_prefetch = 0 : i64, scratch_operands = 0 : i64, tpu.core_type = #tpu.core_type<tc>, window_params = [{transform_indices = @transform_0, window_bounds = array<i64: 16, 32>}, {transform_indices = @transform_1, window_bounds = array<i64: 16, 32>}, {pipeline_mode = #tpu.pipeline_mode<synchronous>, transform_indices = @transform_2, window_bounds = array<i64: 1, 32>}, {pipeline_mode = #tpu.pipeline_mode<synchronous>, transform_indices = @transform_3, window_bounds = array<i64: 1, 32>}, {transform_indices = @transform_4, window_bounds = array<i64: 16, 32>}]} {
    %c0 = arith.constant 0 : index
    %c0_0 = arith.constant 0 : index
    %0 = vector.load %arg1[%c0, %c0_0] : memref<16x32xbf16, #tpu.memory_space<vmem>>, vector<16x32xbf16>
    %1 = arith.extf %0 : vector<16x32xbf16> to vector<16x32xf32>
    %c0_1 = arith.constant 0 : index
    %c0_2 = arith.constant 0 : index
    %2 = vector.load %arg2[%c0_1, %c0_2] : memref<16x32xbf16, #tpu.memory_space<vmem>>, vector<16x32xbf16>
    %3 = arith.extf %2 : vector<16x32xbf16> to vector<16x32xf32>
    %4 = arith.addf %1, %3 : vector<16x32xf32>
    %cst = arith.constant dense<0.000000e+00> : vector<16xf32>
    %5 = vector.multi_reduction <add>, %4, %cst [1] : vector<16x32xf32> to vector<16xf32>
    %6 = vector.shape_cast %5 : vector<16xf32> to vector<16x1xf32>
    %cst_3 = arith.constant 3.200000e+01 : f32
    %7 = vector.broadcast %cst_3 : f32 to vector<16x1xf32>
    %8 = arith.divf %6, %7 : vector<16x1xf32>
    %9 = vector.broadcast %8 : vector<16x1xf32> to vector<16x32xf32>
    %10 = arith.subf %4, %9 : vector<16x32xf32>
    %11 = arith.mulf %10, %10 : vector<16x32xf32>
    %cst_4 = arith.constant dense<0.000000e+00> : vector<16xf32>
    %12 = vector.multi_reduction <add>, %11, %cst_4 [1] : vector<16x32xf32> to vector<16xf32>
    %13 = vector.shape_cast %12 : vector<16xf32> to vector<16x1xf32>
    %cst_5 = arith.constant 3.200000e+01 : f32
    %14 = vector.broadcast %cst_5 : f32 to vector<16x1xf32>
    %15 = arith.divf %13, %14 : vector<16x1xf32>
    %16 = vector.broadcast %8 : vector<16x1xf32> to vector<16x32xf32>
    %17 = arith.subf %4, %16 : vector<16x32xf32>
    %cst_6 = arith.constant 9.99999996E-13 : f32
    %18 = vector.broadcast %cst_6 : f32 to vector<16x1xf32>
    %19 = arith.addf %15, %18 : vector<16x1xf32>
    %20 = math.rsqrt %19 : vector<16x1xf32>
    %21 = vector.broadcast %20 : vector<16x1xf32> to vector<16x32xf32>
    %22 = arith.mulf %17, %21 : vector<16x32xf32>
    %c0_7 = arith.constant 0 : index
    %c0_8 = arith.constant 0 : index
    %23 = vector.load %arg3[%c0_7, %c0_8] : memref<1x32xf32, #tpu.memory_space<vmem>>, vector<1x32xf32>
    %24 = vector.broadcast %23 : vector<1x32xf32> to vector<16x32xf32>
    %25 = arith.mulf %22, %24 : vector<16x32xf32>
    %c0_9 = arith.constant 0 : index
    %c0_10 = arith.constant 0 : index
    %26 = vector.load %arg4[%c0_9, %c0_10] : memref<1x32xf32, #tpu.memory_space<vmem>>, vector<1x32xf32>
    %27 = vector.broadcast %26 : vector<1x32xf32> to vector<16x32xf32>
    %28 = arith.addf %25, %27 : vector<16x32xf32>
    %29 = arith.truncf %28 : vector<16x32xf32> to vector<16x32xbf16>
    %c0_11 = arith.constant 0 : index
    %c0_12 = arith.constant 0 : index
    %30 = vector.load %arg5[%c0_11, %c0_12] : memref<16x32xbf16, #tpu.memory_space<vmem>>, vector<16x32xbf16>
    tpu.vector_store %arg5[%c0_11, %c0_12], %29 {strides = array<i32>} : memref<16x32xbf16, #tpu.memory_space<vmem>>, vector<16x32xbf16>,
    return
  }
  func.func @transform_0(%arg0: i32) -> (i32, i32) {
    %c0_i32 = arith.constant 0 : i32
    %c0_i32_0 = arith.constant 0 : i32
    return %arg0, %c0_i32 : i32, i32
  }
  func.func @transform_1(%arg0: i32) -> (i32, i32) {
    %c0_i32 = arith.constant 0 : i32
    %c0_i32_0 = arith.constant 0 : i32
    return %arg0, %c0_i32 : i32, i32
  }
  func.func @transform_2(%arg0: i32) -> (i32, i32) {
    %c0_i32 = arith.constant 0 : i32
    %c0_i32_0 = arith.constant 0 : i32
    %c0_i32_1 = arith.constant 0 : i32
    return %c0_i32, %c0_i32_0 : i32, i32
  }
  func.func @transform_3(%arg0: i32) -> (i32, i32) {
    %c0_i32 = arith.constant 0 : i32
    %c0_i32_0 = arith.constant 0 : i32
    %c0_i32_1 = arith.constant 0 : i32
    return %c0_i32, %c0_i32_0 : i32, i32
  }
  func.func @transform_4(%arg0: i32) -> (i32, i32) {
    %c0_i32 = arith.constant 0 : i32
    %c0_i32_0 = arith.constant 0 : i32
    return %arg0, %c0_i32 : i32, i32
  }
}

module attributes {stable_mosaic.version = 11 : i64} {
  func.func @kernel(%arg0: i32, %arg1: i32, %arg2: i32, %arg3: memref<1x8x2x16xbf16, #tpu.memory_space<vmem>>, %arg4: memref<1x8x2x16xbf16, #tpu.memory_space<vmem>>, %arg5: memref<1x8x2x16xbf16, #tpu.memory_space<vmem>>, %arg6: memref<1x1x8xf32, #tpu.memory_space<vmem>>, %arg7: memref<32x32xbf16, #tpu.memory_space<vmem>>, %arg8: memref<1x32xf32, #tpu.memory_space<vmem>>, %arg9: memref<1x8x32xbf16, #tpu.memory_space<vmem>>, %arg10: memref<2x8x1xf32, #tpu.memory_space<vmem>>, %arg11: memref<2x8x1xf32, #tpu.memory_space<vmem>>, %arg12: memref<2x8x16xf32, #tpu.memory_space<vmem>>) attributes {dimension_semantics = [#tpu.dimension_semantics<parallel>, #tpu.dimension_semantics<parallel>, #tpu.dimension_semantics<arbitrary>], iteration_bounds = array<i64: 2, 1, 1>, scalar_prefetch = 0 : i64, scratch_operands = 3 : i64, tpu.core_type = #tpu.core_type<tc>, window_params = [{transform_indices = @transform_0, window_bounds = array<i64: 1, 8, 2, 16>}, {transform_indices = @transform_1, window_bounds = array<i64: 1, 8, 2, 16>}, {transform_indices = @transform_2, window_bounds = array<i64: 1, 8, 2, 16>}, {transform_indices = @transform_3, window_bounds = array<i64: 1, 1, 8>}, {pipeline_mode = #tpu.pipeline_mode<synchronous>, transform_indices = @transform_4, window_bounds = array<i64: 32, 32>}, {pipeline_mode = #tpu.pipeline_mode<synchronous>, transform_indices = @transform_5, window_bounds = array<i64: 1, 32>}, {transform_indices = @transform_6, window_bounds = array<i64: 1, 8, 32>}]} {
    %c0_i32 = arith.constant 0 : i32
    %0 = arith.cmpi eq, %arg2, %c0_i32 : i32
    %1 = arith.extui %0 : i1 to i32
    %c0_i32_0 = arith.constant 0 : i32
    %2 = arith.cmpi ne, %1, %c0_i32_0 : i32
    scf.if %2 {
      %cst_39 = arith.constant -1.000000e+30 : f32
      %43 = vector.broadcast %cst_39 : f32 to vector<2x8x1xf32>
      %c0_40 = arith.constant 0 : index
      %c0_41 = arith.constant 0 : index
      %c0_42 = arith.constant 0 : index
      %44 = vector.load %arg10[%c0_40, %c0_41, %c0_42] : memref<2x8x1xf32, #tpu.memory_space<vmem>>, vector<2x8x1xf32>
      tpu.vector_store %arg10[%c0_40, %c0_41, %c0_42], %43 {strides = array<i32>} : memref<2x8x1xf32, #tpu.memory_space<vmem>>, vector<2x8x1xf32>,
      %cst_43 = arith.constant 0.000000e+00 : f32
      %45 = vector.broadcast %cst_43 : f32 to vector<2x8x1xf32>
      %c0_44 = arith.constant 0 : index
      %c0_45 = arith.constant 0 : index
      %c0_46 = arith.constant 0 : index
      %46 = vector.load %arg11[%c0_44, %c0_45, %c0_46] : memref<2x8x1xf32, #tpu.memory_space<vmem>>, vector<2x8x1xf32>
      tpu.vector_store %arg11[%c0_44, %c0_45, %c0_46], %45 {strides = array<i32>} : memref<2x8x1xf32, #tpu.memory_space<vmem>>, vector<2x8x1xf32>,
      %cst_47 = arith.constant 0.000000e+00 : f32
      %47 = vector.broadcast %cst_47 : f32 to vector<2x8x16xf32>
      %c0_48 = arith.constant 0 : index
      %c0_49 = arith.constant 0 : index
      %c0_50 = arith.constant 0 : index
      %48 = vector.load %arg12[%c0_48, %c0_49, %c0_50] : memref<2x8x16xf32, #tpu.memory_space<vmem>>, vector<2x8x16xf32>
      tpu.vector_store %arg12[%c0_48, %c0_49, %c0_50], %47 {strides = array<i32>} : memref<2x8x16xf32, #tpu.memory_space<vmem>>, vector<2x8x16xf32>,
    } else {
    }
    %c0 = arith.constant 0 : index
    %c0_1 = arith.constant 0 : index
    %c0_2 = arith.constant 0 : index
    %c0_3 = arith.constant 0 : index
    %3 = vector.load %arg3[%c0, %c0_1, %c0_2, %c0_3] : memref<1x8x2x16xbf16, #tpu.memory_space<vmem>>, vector<1x8x2x16xbf16>
    %4 = vector.shape_cast %3 : vector<1x8x2x16xbf16> to vector<8x2x16xbf16>
    %c0_4 = arith.constant 0 : index
    %c0_5 = arith.constant 0 : index
    %c0_6 = arith.constant 0 : index
    %c0_7 = arith.constant 0 : index
    %5 = vector.load %arg4[%c0_4, %c0_5, %c0_6, %c0_7] : memref<1x8x2x16xbf16, #tpu.memory_space<vmem>>, vector<1x8x2x16xbf16>
    %6 = vector.shape_cast %5 : vector<1x8x2x16xbf16> to vector<8x2x16xbf16>
    %c0_8 = arith.constant 0 : index
    %c0_9 = arith.constant 0 : index
    %c0_10 = arith.constant 0 : index
    %c0_11 = arith.constant 0 : index
    %7 = vector.load %arg5[%c0_8, %c0_9, %c0_10, %c0_11] : memref<1x8x2x16xbf16, #tpu.memory_space<vmem>>, vector<1x8x2x16xbf16>
    %8 = vector.shape_cast %7 : vector<1x8x2x16xbf16> to vector<8x2x16xbf16>
    %c0_12 = arith.constant 0 : index
    %c0_13 = arith.constant 0 : index
    %c0_14 = arith.constant 0 : index
    %9 = vector.load %arg6[%c0_12, %c0_13, %c0_14] : memref<1x1x8xf32, #tpu.memory_space<vmem>>, vector<1x1x8xf32>
    %10 = vector.shape_cast %9 : vector<1x1x8xf32> to vector<1x8xf32>
    "tpu.trace_start"() <{level = 10 : i32, message = "qhd,khd->hqk"}> : () -> ()
    %cst = arith.constant dense<0.000000e+00> : vector<2x8x8xf32>
    %11 = tpu.matmul %4, %6, %cst {dimension_numbers = #tpu.dot_dimension_numbers<[2], [2], [0], [0], [0, 1, 0, 0, 1, 0], [1], [1]>} : vector<8x2x16xbf16>, vector<8x2x16xbf16>, vector<2x8x8xf32> -> vector<2x8x8xf32>
    "tpu.trace_stop"() : () -> ()
    %cst_15 = arith.constant 2.500000e-01 : f32
    %12 = vector.broadcast %cst_15 : f32 to vector<2x8x8xf32>
    %13 = arith.mulf %11, %12 : vector<2x8x8xf32>
    %14 = vector.shape_cast %10 : vector<1x8xf32> to vector<1x1x8xf32>
    %15 = vector.broadcast %14 : vector<1x1x8xf32> to vector<2x8x8xf32>
    %16 = arith.addf %13, %15 : vector<2x8x8xf32>
    %c0_16 = arith.constant 0 : index
    %c0_17 = arith.constant 0 : index
    %c0_18 = arith.constant 0 : index
    %17 = vector.load %arg10[%c0_16, %c0_17, %c0_18] : memref<2x8x1xf32, #tpu.memory_space<vmem>>, vector<2x8x1xf32>
    %cst_19 = arith.constant dense<0xFF800000> : vector<2x8xf32>
    %18 = vector.multi_reduction <maximumf>, %16, %cst_19 [2] : vector<2x8x8xf32> to vector<2x8xf32>
    %19 = vector.shape_cast %18 : vector<2x8xf32> to vector<2x8x1xf32>
    %20 = arith.maximumf %17, %19 : vector<2x8x1xf32>
    %21 = arith.subf %17, %20 : vector<2x8x1xf32>
    %22 = math.exp %21 : vector<2x8x1xf32>
    %23 = vector.broadcast %20 : vector<2x8x1xf32> to vector<2x8x8xf32>
    %24 = arith.subf %16, %23 : vector<2x8x8xf32>
    %25 = math.exp %24 : vector<2x8x8xf32>
    %c0_20 = arith.constant 0 : index
    %c0_21 = arith.constant 0 : index
    %c0_22 = arith.constant 0 : index
    %26 = vector.load %arg11[%c0_20, %c0_21, %c0_22] : memref<2x8x1xf32, #tpu.memory_space<vmem>>, vector<2x8x1xf32>
    %27 = arith.mulf %22, %26 : vector<2x8x1xf32>
    %cst_23 = arith.constant dense<0.000000e+00> : vector<2x8xf32>
    %28 = vector.multi_reduction <add>, %25, %cst_23 [2] : vector<2x8x8xf32> to vector<2x8xf32>
    %29 = vector.shape_cast %28 : vector<2x8xf32> to vector<2x8x1xf32>
    %30 = arith.addf %27, %29 : vector<2x8x1xf32>
    %c0_24 = arith.constant 0 : index
    %c0_25 = arith.constant 0 : index
    %c0_26 = arith.constant 0 : index
    %31 = vector.load %arg11[%c0_24, %c0_25, %c0_26] : memref<2x8x1xf32, #tpu.memory_space<vmem>>, vector<2x8x1xf32>
    tpu.vector_store %arg11[%c0_24, %c0_25, %c0_26], %30 {strides = array<i32>} : memref<2x8x1xf32, #tpu.memory_space<vmem>>, vector<2x8x1xf32>,
    %c0_27 = arith.constant 0 : index
    %c0_28 = arith.constant 0 : index
    %c0_29 = arith.constant 0 : index
    %32 = vector.load %arg12[%c0_27, %c0_28, %c0_29] : memref<2x8x16xf32, #tpu.memory_space<vmem>>, vector<2x8x16xf32>
    %33 = vector.broadcast %22 : vector<2x8x1xf32> to vector<2x8x16xf32>
    %34 = arith.mulf %33, %32 : vector<2x8x16xf32>
    %35 = arith.truncf %25 : vector<2x8x8xf32> to vector<2x8x8xbf16>
    "tpu.trace_start"() <{level = 10 : i32, message = "hqk,khd->hqd"}> : () -> ()
    %cst_30 = arith.constant dense<0.000000e+00> : vector<2x8x16xf32>
    %36 = tpu.matmul %35, %8, %cst_30 {dimension_numbers = #tpu.dot_dimension_numbers<[2], [0], [1], [2], [0, 0, 0, 1, 1, 2], [0], [1]>} : vector<2x8x8xbf16>, vector<8x2x16xbf16>, vector<2x8x16xf32> -> vector<2x8x16xf32>
    "tpu.trace_stop"() : () -> ()
    %37 = arith.addf %34, %36 : vector<2x8x16xf32>
    %c0_31 = arith.constant 0 : index
    %c0_32 = arith.constant 0 : index
    %c0_33 = arith.constant 0 : index
    %38 = vector.load %arg12[%c0_31, %c0_32, %c0_33] : memref<2x8x16xf32, #tpu.memory_space<vmem>>, vector<2x8x16xf32>
    tpu.vector_store %arg12[%c0_31, %c0_32, %c0_33], %37 {strides = array<i32>} : memref<2x8x16xf32, #tpu.memory_space<vmem>>, vector<2x8x16xf32>,
    %c0_34 = arith.constant 0 : index
    %c0_35 = arith.constant 0 : index
    %c0_36 = arith.constant 0 : index
    %39 = vector.load %arg10[%c0_34, %c0_35, %c0_36] : memref<2x8x1xf32, #tpu.memory_space<vmem>>, vector<2x8x1xf32>
    tpu.vector_store %arg10[%c0_34, %c0_35, %c0_36], %20 {strides = array<i32>} : memref<2x8x1xf32, #tpu.memory_space<vmem>>, vector<2x8x1xf32>,
    %c0_i32_37 = arith.constant 0 : i32
    %40 = arith.cmpi eq, %arg2, %c0_i32_37 : i32
    %41 = arith.extui %40 : i1 to i32
    %c0_i32_38 = arith.constant 0 : i32
    %42 = arith.cmpi ne, %41, %c0_i32_38 : i32
    scf.if %42 {
      %c0_39 = arith.constant 0 : index
      %c0_40 = arith.constant 0 : index
      %c0_41 = arith.constant 0 : index
      %43 = vector.load %arg11[%c0_39, %c0_40, %c0_41] : memref<2x8x1xf32, #tpu.memory_space<vmem>>, vector<2x8x1xf32>
      %cst_42 = arith.constant 1.000000e-30 : f32
      %44 = vector.broadcast %cst_42 : f32 to vector<2x8x1xf32>
      %45 = arith.maximumf %43, %44 : vector<2x8x1xf32>
      %c0_43 = arith.constant 0 : index
      %c0_44 = arith.constant 0 : index
      %c0_45 = arith.constant 0 : index
      %46 = vector.load %arg12[%c0_43, %c0_44, %c0_45] : memref<2x8x16xf32, #tpu.memory_space<vmem>>, vector<2x8x16xf32>
      %47 = tpu.reciprocal %45 {approx = true} : vector<2x8x1xf32> -> vector<2x8x1xf32>
      %48 = vector.broadcast %47 : vector<2x8x1xf32> to vector<2x8x16xf32>
      %49 = arith.mulf %46, %48 : vector<2x8x16xf32>
      %50 = tpu.transpose %49, [1, 0, 2] : vector<2x8x16xf32> -> vector<8x2x16xf32>
      %51 = vector.shape_cast %50 : vector<8x2x16xf32> to vector<8x32xf32>
      %52 = arith.truncf %51 : vector<8x32xf32> to vector<8x32xbf16>
      %c0_46 = arith.constant 0 : index
      %c0_47 = arith.constant 0 : index
      %53 = vector.load %arg7[%c0_46, %c0_47] : memref<32x32xbf16, #tpu.memory_space<vmem>>, vector<32x32xbf16>
      %cst_48 = arith.constant dense<0.000000e+00> : vector<8x32xf32>
      %54 = tpu.matmul %52, %53, %cst_48 {dimension_numbers = #tpu.dot_dimension_numbers<[1], [0], [0], [1], [0, 0, 1, 1], [], []>} : vector<8x32xbf16>, vector<32x32xbf16>, vector<8x32xf32> -> vector<8x32xf32>
      %c0_49 = arith.constant 0 : index
      %c0_50 = arith.constant 0 : index
      %55 = vector.load %arg8[%c0_49, %c0_50] : memref<1x32xf32, #tpu.memory_space<vmem>>, vector<1x32xf32>
      %56 = vector.broadcast %55 : vector<1x32xf32> to vector<8x32xf32>
      %57 = arith.addf %54, %56 : vector<8x32xf32>
      %58 = vector.shape_cast %57 : vector<8x32xf32> to vector<1x8x32xf32>
      %59 = arith.truncf %58 : vector<1x8x32xf32> to vector<1x8x32xbf16>
      %c0_51 = arith.constant 0 : index
      %c0_52 = arith.constant 0 : index
      %c0_53 = arith.constant 0 : index
      %60 = vector.load %arg9[%c0_51, %c0_52, %c0_53] : memref<1x8x32xbf16, #tpu.memory_space<vmem>>, vector<1x8x32xbf16>
      tpu.vector_store %arg9[%c0_51, %c0_52, %c0_53], %59 {strides = array<i32>} : memref<1x8x32xbf16, #tpu.memory_space<vmem>>, vector<1x8x32xbf16>,
    } else {
    }
    return
  }
  func.func @transform_0(%arg0: i32, %arg1: i32, %arg2: i32) -> (i32, i32, i32, i32) {
    %c0_i32 = arith.constant 0 : i32
    %c0_i32_0 = arith.constant 0 : i32
    %c0_i32_1 = arith.constant 0 : i32
    return %arg0, %arg1, %c0_i32, %c0_i32_0 : i32, i32, i32, i32
  }
  func.func @transform_1(%arg0: i32, %arg1: i32, %arg2: i32) -> (i32, i32, i32, i32) {
    %c0_i32 = arith.constant 0 : i32
    %c0_i32_0 = arith.constant 0 : i32
    %c0_i32_1 = arith.constant 0 : i32
    return %arg0, %arg2, %c0_i32, %c0_i32_0 : i32, i32, i32, i32
  }
  func.func @transform_2(%arg0: i32, %arg1: i32, %arg2: i32) -> (i32, i32, i32, i32) {
    %c0_i32 = arith.constant 0 : i32
    %c0_i32_0 = arith.constant 0 : i32
    %c0_i32_1 = arith.constant 0 : i32
    return %arg0, %arg2, %c0_i32, %c0_i32_0 : i32, i32, i32, i32
  }
  func.func @transform_3(%arg0: i32, %arg1: i32, %arg2: i32) -> (i32, i32, i32) {
    %c0_i32 = arith.constant 0 : i32
    %c0_i32_0 = arith.constant 0 : i32
    return %arg0, %c0_i32, %arg2 : i32, i32, i32
  }
  func.func @transform_4(%arg0: i32, %arg1: i32, %arg2: i32) -> (i32, i32) {
    %c0_i32 = arith.constant 0 : i32
    %c0_i32_0 = arith.constant 0 : i32
    %c0_i32_1 = arith.constant 0 : i32
    return %c0_i32, %c0_i32_0 : i32, i32
  }
  func.func @transform_5(%arg0: i32, %arg1: i32, %arg2: i32) -> (i32, i32) {
    %c0_i32 = arith.constant 0 : i32
    %c0_i32_0 = arith.constant 0 : i32
    %c0_i32_1 = arith.constant 0 : i32
    return %c0_i32, %c0_i32_0 : i32, i32
  }
  func.func @transform_6(%arg0: i32, %arg1: i32, %arg2: i32) -> (i32, i32, i32) {
    %c0_i32 = arith.constant 0 : i32
    %c0_i32_0 = arith.constant 0 : i32
    return %arg0, %arg1, %c0_i32 : i32, i32, i32
  }
}

module attributes {stable_mosaic.version = 11 : i64} {
  func.func @kernel(%arg0: i32, %arg1: i32, %arg2: memref<16x64xbf16, #tpu.memory_space<vmem>>, %arg3: memref<64x32xbf16, #tpu.memory_space<vmem>>, %arg4: memref<1x32xf32, #tpu.memory_space<vmem>>, %arg5: memref<16x32xbf16, #tpu.memory_space<vmem>>) attributes {dimension_semantics = [#tpu.dimension_semantics<parallel>, #tpu.dimension_semantics<parallel>], iteration_bounds = array<i64: 1, 1>, scalar_prefetch = 0 : i64, scratch_operands = 0 : i64, tpu.core_type = #tpu.core_type<tc>, window_params = [{transform_indices = @transform_0, window_bounds = array<i64: 16, 64>}, {transform_indices = @transform_1, window_bounds = array<i64: 64, 32>}, {transform_indices = @transform_2, window_bounds = array<i64: 1, 32>}, {transform_indices = @transform_3, window_bounds = array<i64: 16, 32>}]} {
    %c0 = arith.constant 0 : index
    %c0_0 = arith.constant 0 : index
    %0 = vector.load %arg2[%c0, %c0_0] : memref<16x64xbf16, #tpu.memory_space<vmem>>, vector<16x64xbf16>
    %c0_1 = arith.constant 0 : index
    %c0_2 = arith.constant 0 : index
    %1 = vector.load %arg3[%c0_1, %c0_2] : memref<64x32xbf16, #tpu.memory_space<vmem>>, vector<64x32xbf16>
    %cst = arith.constant dense<0.000000e+00> : vector<16x32xf32>
    %2 = tpu.matmul %0, %1, %cst {dimension_numbers = #tpu.dot_dimension_numbers<[1], [0], [0], [1], [0, 0, 1, 1], [], []>} : vector<16x64xbf16>, vector<64x32xbf16>, vector<16x32xf32> -> vector<16x32xf32>
    %c0_3 = arith.constant 0 : index
    %c0_4 = arith.constant 0 : index
    %3 = vector.load %arg4[%c0_3, %c0_4] : memref<1x32xf32, #tpu.memory_space<vmem>>, vector<1x32xf32>
    %4 = vector.broadcast %3 : vector<1x32xf32> to vector<16x32xf32>
    %5 = arith.addf %2, %4 : vector<16x32xf32>
    %6 = arith.truncf %5 : vector<16x32xf32> to vector<16x32xbf16>
    %c0_5 = arith.constant 0 : index
    %c0_6 = arith.constant 0 : index
    %7 = vector.load %arg5[%c0_5, %c0_6] : memref<16x32xbf16, #tpu.memory_space<vmem>>, vector<16x32xbf16>
    tpu.vector_store %arg5[%c0_5, %c0_6], %6 {strides = array<i32>} : memref<16x32xbf16, #tpu.memory_space<vmem>>, vector<16x32xbf16>,
    return
  }
  func.func @transform_0(%arg0: i32, %arg1: i32) -> (i32, i32) {
    %c0_i32 = arith.constant 0 : i32
    %c0_i32_0 = arith.constant 0 : i32
    return %arg0, %c0_i32 : i32, i32
  }
  func.func @transform_1(%arg0: i32, %arg1: i32) -> (i32, i32) {
    %c0_i32 = arith.constant 0 : i32
    %c0_i32_0 = arith.constant 0 : i32
    return %c0_i32, %arg1 : i32, i32
  }
  func.func @transform_2(%arg0: i32, %arg1: i32) -> (i32, i32) {
    %c0_i32 = arith.constant 0 : i32
    %c0_i32_0 = arith.constant 0 : i32
    return %c0_i32, %arg1 : i32, i32
  }
  func.func @transform_3(%arg0: i32, %arg1: i32) -> (i32, i32) {
    %c0_i32 = arith.constant 0 : i32
    return %arg0, %arg1 : i32, i32
  }
}

module attributes {stable_mosaic.version = 11 : i64} {
  func.func @kernel(%arg0: i32, %arg1: i32, %arg2: memref<16x32xbf16, #tpu.memory_space<vmem>>, %arg3: memref<32x64xbf16, #tpu.memory_space<vmem>>, %arg4: memref<1x64xf32, #tpu.memory_space<vmem>>, %arg5: memref<16x64xbf16, #tpu.memory_space<vmem>>) attributes {dimension_semantics = [#tpu.dimension_semantics<parallel>, #tpu.dimension_semantics<parallel>], iteration_bounds = array<i64: 1, 1>, scalar_prefetch = 0 : i64, scratch_operands = 0 : i64, tpu.core_type = #tpu.core_type<tc>, window_params = [{transform_indices = @transform_0, window_bounds = array<i64: 16, 32>}, {transform_indices = @transform_1, window_bounds = array<i64: 32, 64>}, {transform_indices = @transform_2, window_bounds = array<i64: 1, 64>}, {transform_indices = @transform_3, window_bounds = array<i64: 16, 64>}]} {
    %c0 = arith.constant 0 : index
    %c0_0 = arith.constant 0 : index
    %0 = vector.load %arg2[%c0, %c0_0] : memref<16x32xbf16, #tpu.memory_space<vmem>>, vector<16x32xbf16>
    %c0_1 = arith.constant 0 : index
    %c0_2 = arith.constant 0 : index
    %1 = vector.load %arg3[%c0_1, %c0_2] : memref<32x64xbf16, #tpu.memory_space<vmem>>, vector<32x64xbf16>
    %cst = arith.constant dense<0.000000e+00> : vector<16x64xf32>
    %2 = tpu.matmul %0, %1, %cst {dimension_numbers = #tpu.dot_dimension_numbers<[1], [0], [0], [1], [0, 0, 1, 1], [], []>} : vector<16x32xbf16>, vector<32x64xbf16>, vector<16x64xf32> -> vector<16x64xf32>
    %c0_3 = arith.constant 0 : index
    %c0_4 = arith.constant 0 : index
    %3 = vector.load %arg4[%c0_3, %c0_4] : memref<1x64xf32, #tpu.memory_space<vmem>>, vector<1x64xf32>
    %4 = vector.broadcast %3 : vector<1x64xf32> to vector<16x64xf32>
    %5 = arith.addf %2, %4 : vector<16x64xf32>
    %6 = arith.mulf %5, %5 : vector<16x64xf32>
    %7 = arith.mulf %5, %6 : vector<16x64xf32>
    %cst_5 = arith.constant 4.471500e-02 : f32
    %8 = vector.broadcast %cst_5 : f32 to vector<16x64xf32>
    %9 = arith.mulf %8, %7 : vector<16x64xf32>
    %10 = arith.addf %5, %9 : vector<16x64xf32>
    %cst_6 = arith.constant 0.797884583 : f32
    %11 = vector.broadcast %cst_6 : f32 to vector<16x64xf32>
    %12 = arith.mulf %11, %10 : vector<16x64xf32>
    %13 = math.tanh %12 : vector<16x64xf32>
    %cst_7 = arith.constant 1.000000e+00 : f32
    %14 = vector.broadcast %cst_7 : f32 to vector<16x64xf32>
    %15 = arith.addf %14, %13 : vector<16x64xf32>
    %cst_8 = arith.constant 5.000000e-01 : f32
    %16 = vector.broadcast %cst_8 : f32 to vector<16x64xf32>
    %17 = arith.mulf %16, %15 : vector<16x64xf32>
    %18 = arith.mulf %5, %17 : vector<16x64xf32>
    %19 = arith.truncf %18 : vector<16x64xf32> to vector<16x64xbf16>
    %c0_9 = arith.constant 0 : index
    %c0_10 = arith.constant 0 : index
    %20 = vector.load %arg5[%c0_9, %c0_10] : memref<16x64xbf16, #tpu.memory_space<vmem>>, vector<16x64xbf16>
    tpu.vector_store %arg5[%c0_9, %c0_10], %19 {strides = array<i32>} : memref<16x64xbf16, #tpu.memory_space<vmem>>, vector<16x64xbf16>,
    return
  }
  func.func @transform_0(%arg0: i32, %arg1: i32) -> (i32, i32) {
    %c0_i32 = arith.constant 0 : i32
    %c0_i32_0 = arith.constant 0 : i32
    return %arg0, %c0_i32 : i32, i32
  }
  func.func @transform_1(%arg0: i32, %arg1: i32) -> (i32, i32) {
    %c0_i32 = arith.constant 0 : i32
    %c0_i32_0 = arith.constant 0 : i32
    return %c0_i32, %arg1 : i32, i32
  }
  func.func @transform_2(%arg0: i32, %arg1: i32) -> (i32, i32) {
    %c0_i32 = arith.constant 0 : i32
    %c0_i32_0 = arith.constant 0 : i32
    return %c0_i32, %arg1 : i32, i32
  }
  func.func @transform_3(%arg0: i32, %arg1: i32) -> (i32, i32) {
    %c0_i32 = arith.constant 0 : i32
    return %arg0, %arg1 : i32, i32
  }
}

module attributes {stable_mosaic.version = 11 : i64} {
  func.func @_head_kernel(%arg0: i32, %arg1: memref<8x32xbf16, #tpu.memory_space<vmem>>, %arg2: memref<32x32xbf16, #tpu.memory_space<vmem>>, %arg3: memref<1x32xf32, #tpu.memory_space<vmem>>, %arg4: memref<32x128xbf16, #tpu.memory_space<vmem>>, %arg5: memref<1x128xf32, #tpu.memory_space<vmem>>, %arg6: memref<8x128xf32, #tpu.memory_space<vmem>>) attributes {dimension_semantics = [#tpu.dimension_semantics<arbitrary>], iteration_bounds = array<i64: 1>, scalar_prefetch = 0 : i64, scratch_operands = 0 : i64, tpu.core_type = #tpu.core_type<tc>, window_params = [{pipeline_mode = #tpu.pipeline_mode<synchronous>, transform_indices = @transform_0, window_bounds = array<i64: 8, 32>}, {pipeline_mode = #tpu.pipeline_mode<synchronous>, transform_indices = @transform_1, window_bounds = array<i64: 32, 32>}, {pipeline_mode = #tpu.pipeline_mode<synchronous>, transform_indices = @transform_2, window_bounds = array<i64: 1, 32>}, {pipeline_mode = #tpu.pipeline_mode<synchronous>, transform_indices = @transform_3, window_bounds = array<i64: 32, 128>}, {pipeline_mode = #tpu.pipeline_mode<synchronous>, transform_indices = @transform_4, window_bounds = array<i64: 1, 128>}, {pipeline_mode = #tpu.pipeline_mode<synchronous>, transform_indices = @transform_5, window_bounds = array<i64: 8, 128>}]} {
    %c0 = arith.constant 0 : index
    %c0_0 = arith.constant 0 : index
    %0 = vector.load %arg1[%c0, %c0_0] : memref<8x32xbf16, #tpu.memory_space<vmem>>, vector<8x32xbf16>
    %c0_1 = arith.constant 0 : index
    %c0_2 = arith.constant 0 : index
    %1 = vector.load %arg2[%c0_1, %c0_2] : memref<32x32xbf16, #tpu.memory_space<vmem>>, vector<32x32xbf16>
    %cst = arith.constant dense<0.000000e+00> : vector<8x32xf32>
    %2 = tpu.matmul %0, %1, %cst {dimension_numbers = #tpu.dot_dimension_numbers<[1], [0], [0], [1], [0, 0, 1, 1], [], []>} : vector<8x32xbf16>, vector<32x32xbf16>, vector<8x32xf32> -> vector<8x32xf32>
    %c0_3 = arith.constant 0 : index
    %c0_4 = arith.constant 0 : index
    %3 = vector.load %arg3[%c0_3, %c0_4] : memref<1x32xf32, #tpu.memory_space<vmem>>, vector<1x32xf32>
    %4 = vector.broadcast %3 : vector<1x32xf32> to vector<8x32xf32>
    %5 = arith.addf %2, %4 : vector<8x32xf32>
    %6 = math.tanh %5 : vector<8x32xf32>
    %7 = arith.truncf %6 : vector<8x32xf32> to vector<8x32xbf16>
    %c0_5 = arith.constant 0 : index
    %c0_6 = arith.constant 0 : index
    %8 = vector.load %arg4[%c0_5, %c0_6] : memref<32x128xbf16, #tpu.memory_space<vmem>>, vector<32x128xbf16>
    %cst_7 = arith.constant dense<0.000000e+00> : vector<8x128xf32>
    %9 = tpu.matmul %7, %8, %cst_7 {dimension_numbers = #tpu.dot_dimension_numbers<[1], [0], [0], [1], [0, 0, 1, 1], [], []>} : vector<8x32xbf16>, vector<32x128xbf16>, vector<8x128xf32> -> vector<8x128xf32>
    %c0_8 = arith.constant 0 : index
    %c0_9 = arith.constant 0 : index
    %10 = vector.load %arg5[%c0_8, %c0_9] : memref<1x128xf32, #tpu.memory_space<vmem>>, vector<1x128xf32>
    %11 = vector.broadcast %10 : vector<1x128xf32> to vector<8x128xf32>
    %12 = arith.addf %9, %11 : vector<8x128xf32>
    %c0_10 = arith.constant 0 : index
    %c0_11 = arith.constant 0 : index
    %13 = vector.load %arg6[%c0_10, %c0_11] : memref<8x128xf32, #tpu.memory_space<vmem>>, vector<8x128xf32>
    tpu.vector_store %arg6[%c0_10, %c0_11], %12 {strides = array<i32>} : memref<8x128xf32, #tpu.memory_space<vmem>>, vector<8x128xf32>,
    return
  }
  func.func @transform_0(%arg0: i32) -> (i32, i32) {
    %c0_i32 = arith.constant 0 : i32
    %c0_i32_0 = arith.constant 0 : i32
    %c0_i32_1 = arith.constant 0 : i32
    return %c0_i32, %c0_i32_0 : i32, i32
  }
  func.func @transform_1(%arg0: i32) -> (i32, i32) {
    %c0_i32 = arith.constant 0 : i32
    %c0_i32_0 = arith.constant 0 : i32
    %c0_i32_1 = arith.constant 0 : i32
    return %c0_i32, %c0_i32_0 : i32, i32
  }
  func.func @transform_2(%arg0: i32) -> (i32, i32) {
    %c0_i32 = arith.constant 0 : i32
    %c0_i32_0 = arith.constant 0 : i32
    %c0_i32_1 = arith.constant 0 : i32
    return %c0_i32, %c0_i32_0 : i32, i32
  }
  func.func @transform_3(%arg0: i32) -> (i32, i32) {
    %c0_i32 = arith.constant 0 : i32
    %c0_i32_0 = arith.constant 0 : i32
    %c0_i32_1 = arith.constant 0 : i32
    return %c0_i32, %c0_i32_0 : i32, i32
  }
  func.func @transform_4(%arg0: i32) -> (i32, i32) {
    %c0_i32 = arith.constant 0 : i32
    %c0_i32_0 = arith.constant 0 : i32
    %c0_i32_1 = arith.constant 0 : i32
    return %c0_i32, %c0_i32_0 : i32, i32
  }
  func.func @transform_5(%arg0: i32) -> (i32, i32) {
    %c0_i32 = arith.constant 0 : i32
    %c0_i32_0 = arith.constant 0 : i32
    %c0_i32_1 = arith.constant 0 : i32
    return %c0_i32, %c0_i32_0 : i32, i32
  }
}

</mosaic_0001>

<bundles_post_ra>
// kernel: sentiment_forward.11
= control target key start
LH: loop header
LB: loop body
LE: loop exit
PB: predicated region body
PF: predicated region fallthrough
CT: control target
= control target key end

     0   :  { %v130_v0 = vmov 0.0   ;;  %vm131_vm0 = vmmov 0   ;;  %vm45_vm1 = vcmask 261120   ;;  %vm98_vm2 = vcmask 257024   ;;  %s170_s1 = inlined_call_operand.vmem [shape: bf16[32,32], index: 1, kind: input, shape index: {}]   ;;  %s171_s0 = inlined_call_operand.vmem [shape: bf16[16,32], index: 0, kind: input, shape index: {}]   ;;  %s172_s2 = inlined_call_operand.vmem [shape: f32[1,32], index: 2, kind: input, shape index: {}]   ;;  %s173_s3 = inlined_call_operand.vmem [shape: bf16[16,32], index: 3, kind: output, shape index: {}]  }
   0x1   :  { %117 = vmatprep.subr.bf16.mxu0 %v130_v0  ;;  %v127_v1 = vld [vmem:[%s170_s1] sm:$0xff]   ;;  %121 = vmatprep.mubr.msk.bf16.mxu0 %vm131_vm0, %v130_v0  ;;  %v128_v2 = vld [vmem:[%s170_s1 + $0x8] sm:$0xff]  }
   0x2   :  { %118 = vmatpush3.bf16.msra.mxu0 %v127_v1  ;;  %v129_v3 = vld [vmem:[%s171_s0] sm:$0xff]  }
   0x3   :  { %119 = vmatprep.subr.bf16.mxu0 %v130_v0  ;;  %v105_v4 = vld [vmem:[%s172_s2] ss:$0 sm:$0xff] }
   0x6   :  { %120 = vmatpush3.bf16.msra.mxu0 %v128_v2 }
   0x9   :  { %122 = vmatmul.mubr.msk.bf16.vlgmr.msra.gmra.mrb[0].mxu0 %vm45_vm1, %v129_v3 }
  0xdc   :  { %v83_v5 = vpop.f32.mrb[0].mxu0 }
  0xdd   :  { %v84_v6 = vadd.f32 %v105_v4, %v83_v5  ;;  %v123_v7 = vpop.f32.mrb[1].mxu0 }
  0xde   :  { %v86_v8 = vpop.f32.mrb[2].mxu0 }
  0xdf   :  { %v112_v9 = vpack.c.bf16 %v84_v6, %v84_v6  ;;  %v87_v10 = vadd.f32 %v105_v4, %v86_v8  ;;  %v124_v11 = vpop.f32.mrb[3].mxu0 }
  0xe1   :  { %99 = vst.msk [vmem:[%s173_s3] sm:$0xf] %vm98_vm2, %v112_v9  ;;  %v113_v12 = vpack.c.bf16 %v87_v10, %v87_v10 }
  0xe3   :  { %100 = vst.msk [vmem:[%s173_s3 + $0x4] sm:$0xf] %vm98_vm2, %v113_v12 }

// kernel: sentiment_forward.10
= control target key start
LH: loop header
LB: loop body
LE: loop exit
PB: predicated region body
PF: predicated region fallthrough
CT: control target
= control target key end

     0   :  { %vm16_vm0 = vcmask 261120   ;;  %vm70_vm1 = vcmask 257024   ;;  %s129_s0 = inlined_call_operand.vmem [shape: f32[16,32], index: 0, kind: input, shape index: {}]   ;;  %s130_s1 = inlined_call_operand.vmem [shape: f32[1,32], index: 1, kind: input, shape index: {}]   ;;  %s131_s2 = inlined_call_operand.vmem [shape: f32[1,32], index: 2, kind: input, shape index: {}]   ;;  %s132_s3 = inlined_call_operand.vmem [shape: bf16[16,32], index: 3, kind: output, shape index: {}]  }
   0x1   :  { %v14_v0 = vld [vmem:[%s129_s0] sm:$0xff]  ;;  %v15_v1 = vld [vmem:[%s129_s0 + $0x8] sm:$0xff] }
   0x2   :  { %v17_v2 = vsel %vm16_vm0, %v14_v0, 0.0  ;;  %v20_v3 = vsel %vm16_vm0, %v15_v1, 0.0  ;;  %v77_v21 = vld [vmem:[%s130_s1] ss:$0 sm:$0xff] }
   0x3   :  { %18 = vadd.xlane.f32.xlu0 %v17_v2  ;;  %v78_v23 = vld [vmem:[%s131_s2] ss:$0 sm:$0xff] }
   0x7   :  { %21 = vadd.xlane.f32.xlu0 %v20_v3 }
  0x90   :  { %v19_v4 = vpop.xlane.xlu0 %18 }
  0x91   :  { %v24_v5 = vmul.f32 0.03125, %v19_v4 }
  0x93   :  { %v26_v6 = vsub.f32 %v14_v0, %v24_v5 }
  0x94   :  { %v22_v7 = vpop.xlane.xlu0 %21 }
  0x95   :  { %v25_v8 = vmul.f32 0.03125, %v22_v7  ;;  %v28_v9 = vmul.f32 %v26_v6, %v26_v6 }
  0x97   :  { %v27_v10 = vsub.f32 %v15_v1, %v25_v8  ;;  %v30_v11 = vsel %vm16_vm0, %v28_v9, 0.0 }
  0x98   :  { %31 = vadd.xlane.f32.xlu1 %v30_v11 }
  0x99   :  { %v29_v12 = vmul.f32 %v27_v10, %v27_v10 }
  0x9b   :  { %v33_v13 = vsel %vm16_vm0, %v29_v12, 0.0 }
  0x9c   :  { %34 = vadd.xlane.f32.xlu1 %v33_v13 }
 0x125   :  { %v32_v14 = vpop.xlane.xlu1 %31 }
 0x126   :  { %v36_v15 = vmul.f32 0.03125, %v32_v14 }
 0x128   :  { %v38_v16 = vadd.f32 1e-12, %v36_v15 }
 0x129   :  { %v35_v17 = vpop.xlane.xlu1 %34 }
 0x12a   :  { %83 = vrsqrt.f32 %v38_v16  ;;  %v37_v18 = vmul.f32 0.03125, %v35_v17 }
 0x12c   :  { %v39_v19 = vadd.f32 1e-12, %v37_v18 }
 0x12e   :  { %85 = vrsqrt.f32 %v39_v19 }
 0x134   :  { %v84_v20 = vpop.eup %83 }
 0x135   :  { %v42_v22 = vmul.f32 %v84_v20, %v26_v6 }
 0x137   :  { %v51_v24 = vmul.f32 %v77_v21, %v42_v22 }
 0x138   :  { %v86_v25 = vpop.eup %85 }
 0x139   :  { %v60_v26 = vadd.f32 %v78_v23, %v51_v24  ;;  %v43_v27 = vmul.f32 %v86_v25, %v27_v10 }
 0x13b   :  { %v81_v28 = vpack.c.bf16 %v60_v26, %v60_v26  ;;  %v52_v29 = vmul.f32 %v77_v21, %v43_v27 }
 0x13d   :  { %71 = vst.msk [vmem:[%s132_s3] sm:$0xf] %vm70_vm1, %v81_v28  ;;  %v61_v30 = vadd.f32 %v78_v23, %v52_v29 }
 0x13f   :  { %v82_v31 = vpack.c.bf16 %v61_v30, %v61_v30 }
 0x141   :  { %72 = vst.msk [vmem:[%s132_s3 + $0x4] sm:$0xf] %vm70_vm1, %v82_v31 }

// kernel: sentiment_forward.15
= control target key start
LH: loop header
LB: loop body
LE: loop exit
PB: predicated region body
PF: predicated region fallthrough
CT: control target
= control target key end

     0   :  { %vm27_vm0 = vcmask 261120   ;;  %vm81_vm1 = vcmask 257024   ;;  %s153_s0 = inlined_call_operand.vmem [shape: bf16[16,32], index: 0, kind: input, shape index: {}]   ;;  %s154_s1 = inlined_call_operand.vmem [shape: bf16[16,32], index: 1, kind: input, shape index: {}]   ;;  %s155_s2 = inlined_call_operand.vmem [shape: f32[1,32], index: 2, kind: input, shape index: {}]   ;;  %s156_s3 = inlined_call_operand.vmem [shape: f32[1,32], index: 3, kind: input, shape index: {}]   ;;  %s157_s4 = inlined_call_operand.vmem [shape: bf16[16,32], index: 4, kind: output, shape index: {}]  }
   0x1   :  { %v95_v0 = vld [vmem:[%s153_s0] sm:$0xff]  }
   0x2   :  { %v99_v1 = vld [vmem:[%s154_s1] sm:$0xff]   ;;  %v96_v2 = vunpack.c.l.bf16 %v95_v0  ;;  %v97_v4 = vunpack.c.h.bf16 %v95_v0 }
   0x3   :  { %v100_v3 = vunpack.c.l.bf16 %v99_v1  ;;  %v101_v5 = vunpack.c.h.bf16 %v99_v1  ;;  %v88_v27 = vld [vmem:[%s155_s2] ss:$0 sm:$0xff] }
   0x4   :  { %v89_v29 = vld [vmem:[%s156_s3] ss:$0 sm:$0xff] }
   0x5   :  { %v25_v6 = vadd.f32 %v100_v3, %v96_v2  ;;  %v26_v7 = vadd.f32 %v101_v5, %v97_v4 }
   0x7   :  { %v28_v8 = vsel %vm27_vm0, %v25_v6, 0.0  ;;  %v31_v9 = vsel %vm27_vm0, %v26_v7, 0.0 }
   0x8   :  { %29 = vadd.xlane.f32.xlu0 %v28_v8 }
   0xc   :  { %32 = vadd.xlane.f32.xlu0 %v31_v9 }
  0x95   :  { %v30_v10 = vpop.xlane.xlu0 %29 }
  0x96   :  { %v35_v11 = vmul.f32 0.03125, %v30_v10 }
  0x98   :  { %v37_v12 = vsub.f32 %v25_v6, %v35_v11 }
  0x99   :  { %v33_v13 = vpop.xlane.xlu0 %32 }
  0x9a   :  { %v36_v14 = vmul.f32 0.03125, %v33_v13  ;;  %v39_v15 = vmul.f32 %v37_v12, %v37_v12 }
  0x9c   :  { %v38_v16 = vsub.f32 %v26_v7, %v36_v14  ;;  %v41_v17 = vsel %vm27_vm0, %v39_v15, 0.0 }
  0x9d   :  { %42 = vadd.xlane.f32.xlu1 %v41_v17 }
  0x9e   :  { %v40_v18 = vmul.f32 %v38_v16, %v38_v16 }
  0xa0   :  { %v44_v19 = vsel %vm27_vm0, %v40_v18, 0.0 }
  0xa1   :  { %45 = vadd.xlane.f32.xlu1 %v44_v19 }
 0x12a   :  { %v43_v20 = vpop.xlane.xlu1 %42 }
 0x12b   :  { %v47_v21 = vmul.f32 0.03125, %v43_v20 }
 0x12d   :  { %v49_v22 = vadd.f32 1e-12, %v47_v21 }
 0x12e   :  { %v46_v23 = vpop.xlane.xlu1 %45 }
 0x12f   :  { %102 = vrsqrt.f32 %v49_v22  ;;  %v48_v24 = vmul.f32 0.03125, %v46_v23 }
 0x131   :  { %v50_v25 = vadd.f32 1e-12, %v48_v24 }
 0x133   :  { %104 = vrsqrt.f32 %v50_v25 }
 0x139   :  { %v103_v26 = vpop.eup %102 }
 0x13a   :  { %v53_v28 = vmul.f32 %v103_v26, %v37_v12 }
 0x13c   :  { %v62_v30 = vmul.f32 %v88_v27, %v53_v28 }
 0x13d   :  { %v105_v31 = vpop.eup %104 }
 0x13e   :  { %v71_v32 = vadd.f32 %v89_v29, %v62_v30  ;;  %v54_v33 = vmul.f32 %v105_v31, %v38_v16 }
 0x140   :  { %v92_v34 = vpack.c.bf16 %v71_v32, %v71_v32  ;;  %v63_v35 = vmul.f32 %v88_v27, %v54_v33 }
 0x142   :  { %82 = vst.msk [vmem:[%s157_s4] sm:$0xf] %vm81_vm1, %v92_v34  ;;  %v72_v36 = vadd.f32 %v89_v29, %v63_v35 }
 0x144   :  { %v93_v37 = vpack.c.bf16 %v72_v36, %v72_v36 }
 0x146   :  { %83 = vst.msk [vmem:[%s157_s4 + $0x4] sm:$0xf] %vm81_vm1, %v93_v37 }

// kernel: sentiment_forward.17
= control target key start
LH: loop header
LB: loop body
LE: loop exit
PB: predicated region body
PF: predicated region fallthrough
CT: control target
= control target key end

     0   :  { %v156_v0 = vmov 0.0   ;;  %vm157_vm0 = vmmov 0   ;;  %vm61_vm1 = vcmask 523264   ;;  %vm114_vm2 = vcmask 257024   ;;  %s202_s1 = inlined_call_operand.vmem [shape: bf16[64,32], index: 1, kind: input, shape index: {}]   ;;  %s203_s0 = inlined_call_operand.vmem [shape: bf16[16,64], index: 0, kind: input, shape index: {}]   ;;  %s204_s2 = inlined_call_operand.vmem [shape: f32[1,32], index: 2, kind: input, shape index: {}]   ;;  %s205_s3 = inlined_call_operand.vmem [shape: bf16[16,32], index: 3, kind: output, shape index: {}]  }
   0x1   :  { %137 = vmatprep.subr.bf16.mxu0 %v156_v0  ;;  %v151_v1 = vld [vmem:[%s202_s1] sm:$0xff]   ;;  %145 = vmatprep.mubr.msk.bf16.mxu0 %vm157_vm0, %v156_v0  ;;  %v152_v2 = vld [vmem:[%s202_s1 + $0x8] sm:$0xff]   ;;  %v153_v3 = vld [vmem:[%s202_s1 + $0x10] sm:$0xff]  }
   0x2   :  { %138 = vmatpush3.bf16.msra.mxu0 %v151_v1  ;;  %v154_v4 = vld [vmem:[%s202_s1 + $0x18] sm:$0xff]   ;;  %v155_v5 = vld [vmem:[%s203_s0] sm:$0xff]  }
   0x3   :  { %139 = vmatprep.subr.bf16.mxu0 %v156_v0  ;;  %v121_v6 = vld [vmem:[%s204_s2] ss:$0 sm:$0xff] }
   0x6   :  { %140 = vmatpush3.bf16.msra.mxu0 %v152_v2 }
   0x7   :  { %141 = vmatprep.subr.bf16.mxu0 %v156_v0 }
   0xa   :  { %142 = vmatpush3.bf16.msra.mxu0 %v153_v3 }
   0xb   :  { %143 = vmatprep.subr.bf16.mxu0 %v156_v0 }
   0xe   :  { %144 = vmatpush3.bf16.msra.mxu0 %v154_v4 }
  0x11   :  { %146 = vmatmul.mubr.msk.bf16.vlgmr.msra.gmra.mrb[0].mxu0 %vm61_vm1, %v155_v5 }
  0xe4   :  { %v99_v7 = vpop.f32.mrb[0].mxu0 }
  0xe5   :  { %v100_v8 = vadd.f32 %v121_v6, %v99_v7  ;;  %v147_v9 = vpop.f32.mrb[1].mxu0 }
  0xe6   :  { %v102_v10 = vpop.f32.mrb[2].mxu0 }
  0xe7   :  { %v130_v11 = vpack.c.bf16 %v100_v8, %v100_v8  ;;  %v103_v12 = vadd.f32 %v121_v6, %v102_v10  ;;  %v148_v13 = vpop.f32.mrb[3].mxu0 }
  0xe9   :  { %115 = vst.msk [vmem:[%s205_s3] sm:$0xf] %vm114_vm2, %v130_v11  ;;  %v131_v14 = vpack.c.bf16 %v103_v12, %v103_v12 }
  0xeb   :  { %116 = vst.msk [vmem:[%s205_s3 + $0x4] sm:$0xf] %vm114_vm2, %v131_v14 }

// kernel: sentiment_forward.16
= control target key start
LH: loop header
LB: loop body
LE: loop exit
PB: predicated region body
PF: predicated region fallthrough
CT: control target
= control target key end

     0   :  { %v152_v0 = vmov 0.0   ;;  %vm153_vm0 = vmmov 0   ;;  %vm45_vm1 = vcmask 261120   ;;  %vm116_vm2 = vcmask 519168   ;;  %s192_s1 = inlined_call_operand.vmem [shape: bf16[32,64], index: 1, kind: input, shape index: {}]   ;;  %s193_s0 = inlined_call_operand.vmem [shape: bf16[16,32], index: 0, kind: input, shape index: {}]   ;;  %s194_s2 = inlined_call_operand.vmem [shape: f32[1,64], index: 2, kind: input, shape index: {}]   ;;  %s195_s3 = inlined_call_operand.vmem [shape: bf16[16,64], index: 3, kind: output, shape index: {}]  }
   0x1   :  { %135 = vmatprep.subr.bf16.mxu0 %v152_v0  ;;  %v145_v1 = vld [vmem:[%s192_s1] sm:$0xff]   ;;  %139 = vmatprep.mubr.msk.bf16.mxu0 %vm153_vm0, %v152_v0  ;;  %v146_v2 = vld [vmem:[%s192_s1 + $0x8] sm:$0xff]  }
   0x2   :  { %136 = vmatpush3.bf16.msra.mxu0 %v145_v1  ;;  %v147_v3 = vld [vmem:[%s193_s0] sm:$0xff]  }
   0x3   :  { %137 = vmatprep.subr.bf16.mxu0 %v152_v0  ;;  %v123_v4 = vld [vmem:[%s194_s2] ss:$0 sm:$0xff] }
   0x6   :  { %138 = vmatpush3.bf16.msra.mxu0 %v146_v2 }
   0x9   :  { %140 = vmatmul.mubr.msk.bf16.vlgmr.msra.gmra.mrb[0].mxu0 %vm45_vm1, %v147_v3 }
  0xdc   :  { %v83_v5 = vpop.f32.mrb[0].mxu0 }
  0xdd   :  { %v84_v6 = vadd.f32 %v123_v4, %v83_v5  ;;  %v141_v7 = vpop.f32.mrb[1].mxu0 }
  0xde   :  { %v86_v8 = vpop.f32.mrb[2].mxu0 }
  0xdf   :  { %v90_v9 = vmul.f32 %v84_v6, %v84_v6  ;;  %v87_v10 = vadd.f32 %v123_v4, %v86_v8  ;;  %v142_v11 = vpop.f32.mrb[3].mxu0 }
  0xe1   :  { %v92_v12 = vmul.f32 %v90_v9, %v84_v6  ;;  %v91_v13 = vmul.f32 %v87_v10, %v87_v10 }
  0xe3   :  { %v94_v14 = vmul.f32 0.044715, %v92_v12  ;;  %v93_v15 = vmul.f32 %v91_v13, %v87_v10 }
  0xe5   :  { %v96_v16 = vadd.f32 %v94_v14, %v84_v6  ;;  %v95_v17 = vmul.f32 0.044715, %v93_v15 }
  0xe7   :  { %v98_v18 = vmul.f32 0.7978846, %v96_v16  ;;  %v97_v19 = vadd.f32 %v95_v17, %v87_v10 }
  0xe9   :  { %148 = vtanh.f32 %v98_v18  ;;  %v99_v20 = vmul.f32 0.7978846, %v97_v19 }
  0xeb   :  { %150 = vtanh.f32 %v99_v20 }
  0xf3   :  { %v149_v21 = vpop.eup %148 }
  0xf4   :  { %v102_v22 = vadd.f32 1.0, %v149_v21 }
  0xf5   :  { %v151_v23 = vpop.eup %150 }
  0xf6   :  { %v104_v24 = vmul.f32 0.5, %v102_v22  ;;  %v103_v25 = vadd.f32 1.0, %v151_v23 }
  0xf8   :  { %v106_v26 = vmul.f32 %v104_v24, %v84_v6  ;;  %v105_v27 = vmul.f32 0.5, %v103_v25 }
  0xfa   :  { %v130_v28 = vpack.c.bf16 %v106_v26, %v106_v26  ;;  %v107_v29 = vmul.f32 %v105_v27, %v87_v10 }
  0xfc   :  { %117 = vst.msk [vmem:[%s195_s3] sm:$0xf] %vm116_vm2, %v130_v28  ;;  %v131_v30 = vpack.c.bf16 %v107_v29, %v107_v29 }
  0xfe   :  { %118 = vst.msk [vmem:[%s195_s3 + $0x4] sm:$0xf] %vm116_vm2, %v131_v30 }

// kernel: sentiment_forward.14
= control target key start
LH: loop header
LB: loop body
LE: loop exit
PB: predicated region body
PF: predicated region fallthrough
CT: control target
= control target key end

     0   :  { %s1995_s21 = smov 0   ;;  %s1997_s22 = smov 0   ;;  %s2196_s0 = inlined_call_operand.vmem [shape: bf16[2,8,2,16], index: 0, kind: input, shape index: {}]   ;;  %s2197_s1 = inlined_call_operand.vmem [shape: bf16[2,8,2,16], index: 1, kind: input, shape index: {}]   ;;  %s2198_s2 = inlined_call_operand.vmem [shape: bf16[2,8,2,16], index: 2, kind: input, shape index: {}]   ;;  %s2199_s3 = inlined_call_operand.vmem [shape: f32[2,1,8], index: 3, kind: input, shape index: {}]   ;;  %s2200_s4 = inlined_call_operand.vmem [shape: bf16[32,32], index: 4, kind: input, shape index: {}]   ;;  %s2201_s5 = inlined_call_operand.vmem [shape: f32[1,32], index: 5, kind: input, shape index: {}]   ;;  %s2202_s6 = inlined_call_operand.vmem [shape: bf16[2,8,32], index: 6, kind: output, shape index: {}]  }
   0x1   :  { %s1999_s23 = smov 0  }
   0x2 LB: > { %s35_s24 = sadd.s32 1, %s1946_s22  ;;  %p1819_p0 = scmp.ge.s32.totalorder %s1950_s23, 1  ;;  %s1950_s23 = sphi %s1999_s23, %s16_s23   ;;  %s1946_s22 = sphi %s1997_s22, %s2204_s22   ;;  %s1942_s21 = sphi %s1995_s21, %s2203_s21  }
   0x3   : > { %p37_p1 = scmp.ge.s32.totalorder %s35_s24, 2  ;;  %p284_p2 = scmp.lt.s32.totalorder %s1950_s23, 3 }
   0x5   : > { %s2206_s24 = smov (%p37_p1, %s35_s24), 0  ;;  %p285_p3 = pnand %p1819_p0, %p284_p2 }
   0x6   : > { %p342_p4 = scmp.lt.s32.totalorder (!%p285_p3), %s1942_s21, 1  ;;  %v1952_v12 = vmov (!%p285_p3), 1983009808   ;;  %v608_v14 = vlaneseq (!%p285_p3)  ;;  %v1953_v15 = vmov (!%p285_p3), 1934713408   ;;  %vm1956_vm0 = vmmov (!%p285_p3), 0  }
   0x7   : > { %288 = sbr.rel (%p285_p3) target bundleno = 1446 (0x5a6), region = 44  ;;  %v606_v13 = vunpack.c.l.s4 (!%p285_p3), %v1952_v12  ;;  %v638_v16 = vunpack.c.l.s4 (!%p285_p3), %v1953_v15  ;;  %vm391_vm1 = vcmask (!%p285_p3), 130048   ;;  %vm386_vm2 = vcmask (!%p285_p3), 7168   ;;  %s1959_s18 = smov (!%p285_p3), 16  }
   0x8   : > { %v2022_v20 = vshrl.u32 (!%p285_p3), %v608_v14, 7  ;;  %vm1248_vm3 = vcmask (!%p285_p3), 64512   ;;  %vm1361_vm4 = vcmask (!%p285_p3), 1043456   ;;  %vm1649_vm5 = vcmask (!%p285_p3), 261120  }
   0x9   : > { %v607_v19 = vunpack.c.0.s8 (!%p285_p3), %v606_v13  ;;  %v639_v26 = vunpack.c.0.s8 (!%p285_p3), %v638_v16  ;;  %vm1694_vm6 = vcmask (!%p285_p3), 257024  }
   0xb   : > { %v2025_v32 = vsub.s32 (!%p285_p3), %v607_v19, %v2022_v20  ;;  %v2030_v47 = vsub.s32 (!%p285_p3), %v639_v26, %v2022_v20 }
   0xe   : > { %s2208_s21 = smov (!%p342_p4, %s1942_s21), 1 }
   0xf   : > { %s2016_s25 = sshll.u32 %s2208_s21, 3  ;;  %s373_s10 = scalar_lea.vmem %s2199_s3, %s2208_s21 }
  0x10   : > { %s357_s28 = scalar_lea.vmem %s2197_s1, %s2016_s25  ;;  %s348_s7 = scalar_lea.vmem %s2196_s0, %s2016_s25 }
  0x11   : > { %v404_v0 = vld [vmem:[%s357_s28 + $0x2] sm:$0x1]  ;;  %v402_v1 = vld [vmem:[%s357_s28] sm:$0x1]  ;;  %v405_v2 = vld [vmem:[%s357_s28 + $0x3] sm:$0x1]  ;;  %s366_s13 = scalar_lea.vmem %s2198_s2, %s2016_s25 }
  0x12   : > { %475 = vxpose.xlu1.c.b16.start.end [1/1] (short) (narrow) %v404_v0, 16  ;;  %443 = vxpose.xlu0.c.b16.start.end [1/1] (short) (narrow) %v402_v1, 16  ;;  %v403_v3 = vld [vmem:[%s357_s28 + $0x1] sm:$0x1]  ;;  %v407_v4 = vld [vmem:[%s357_s28 + $0x5] sm:$0x1] }
  0x13   : > { %v406_v5 = vld [vmem:[%s357_s28 + $0x4] sm:$0x1]  ;;  %v409_v6 = vld [vmem:[%s357_s28 + $0x7] sm:$0x1]  ;;  %v408_v7 = vld [vmem:[%s357_s28 + $0x6] sm:$0x1] }
  0x14   : > { %s1823_s25 = sshll.u32 %s2208_s21, 2 }
  0x15   : > { %s380_s28 = scalar_lea.vmem %s2202_s6, %s1823_s25 }
  0x16   : > { %491 = vxpose.xlu1.c.b16.start.end [1/1] (short) (narrow) %v405_v2, 16  ;;  %459 = vxpose.xlu0.c.b16.start.end [1/1] (short) (narrow) %v403_v3, 16 }
  0x1a   : > { %523 = vxpose.xlu1.c.b16.start.end [1/1] (short) (narrow) %v407_v4, 16  ;;  %507 = vxpose.xlu0.c.b16.start.end [1/1] (short) (narrow) %v406_v5, 16 }
  0x1e   : > { %555 = vxpose.xlu1.c.b16.start.end [1/1] (short) (narrow) %v409_v6, 16  ;;  %539 = vxpose.xlu0.c.b16.start.end [1/1] (short) (narrow) %v408_v7, 16 }
  0x78   : > { %v483_v8 = vpop.trf.xlu1  ;;  %v451_v9 = vpop.trf.xlu0 }
  0x79   : > { %v575_v27 = vshrl.u32 %v451_v9, 16  ;;  %v583_v37 = vshrl.u32 %v483_v8, 16 }
  0x7c   : > { %v499_v10 = vpop.trf.xlu1  ;;  %v467_v11 = vpop.trf.xlu0 }
  0x7d   : > { %v576_v24 = vshrl.u32 %v467_v11, 16  ;;  %v573_v25 = vpack.i.b16 %v467_v11, %v451_v9  ;;  %v584_v28 = vshrl.u32 %v499_v10, 16  ;;  %v581_v33 = vpack.i.b16 %v499_v10, %v483_v8 }
  0x7e   : > { %v1954_v9 = vmov 0.0   ;;  %v1955_v11 = vmov 0  }
  0x7f   : > { %v577_v38 = vpack.i.b16 %v576_v24, %v575_v27  ;;  %v585_v41 = vpack.i.b16 %v584_v28, %v583_v37  ;;  %1848 = vmatprep.subr.bf16.mxu0 %v1954_v9  ;;  %1854 = vmatprep.subr.bf16.mxu1 %v1954_v9  ;;  %392 = vst.msk [vmem:[#allocation4] sm:$0xff] %vm391_vm1, %v1954_v9  ;;  %393 = vst.msk [vmem:[#allocation4 + $0x8] sm:$0xff] %vm391_vm1, %v1954_v9  ;;  %v398_v37 = vld [vmem:[%s348_s7 + $0x4] sm:$0x1] }
  0x80   : > { %v531_v17 = vpop.trf.xlu1  ;;  %v515_v18 = vpop.trf.xlu0  ;;  %1850 = vmatprep.mubr.msk.bf16.mxu0 %vm1956_vm0, %v1954_v9  ;;  %1856 = vmatprep.mubr.msk.bf16.mxu1 %vm1956_vm0, %v1954_v9  ;;  %389 = vst.msk [vmem:[#allocation3] sm:$0xff] %vm386_vm2, %v1954_v9  ;;  %390 = vst.msk [vmem:[#allocation3 + $0x8] sm:$0xff] %vm386_vm2, %v1954_v9 }
  0x81   : > { %v592_v21 = vshrl.u32 %v531_v17, 16  ;;  %v589_v22 = vpack.i.b16 %v531_v17, %v515_v18  ;;  %v591_v23 = vshrl.u32 %v515_v18, 16 }
  0x83   : > { %v593_v29 = vpack.i.b16 %v592_v21, %v591_v23  ;;  %v603_v34 = vcombine.low %v573_v25, %v589_v22  ;;  %v604_v49 = vcombine.high %v573_v25, %v589_v22 }
  0x84   : > { %v563_v30 = vpop.trf.xlu1  ;;  %v547_v31 = vpop.trf.xlu0 }
  0x85   : > { %v600_v35 = vshrl.u32 %v563_v30, 16  ;;  %v597_v36 = vpack.i.b16 %v563_v30, %v547_v31  ;;  %v599_v39 = vshrl.u32 %v547_v31, 16  ;;  %v671_v42 = vcombine.low %v577_v38, %v593_v29 }
  0x86   : > { %v611_v45 = vrot.slane %v603_v34, %v2025_v32  ;;  %v672_v57 = vcombine.high %v577_v38, %v593_v29  ;;  %v618_v59 = vrot.slane %v604_v49, %v2025_v32  ;;  %v395_v34 = vld [vmem:[%s348_s7 + $0x1] sm:$0x1]  ;;  %v399_v38 = vld [vmem:[%s348_s7 + $0x5] sm:$0x1] }
  0x87   : > { %v619_v40 = vcombine.low %v581_v33, %v597_v36  ;;  %v601_v43 = vpack.i.b16 %v600_v35, %v599_v39  ;;  %v620_v44 = vcombine.high %v581_v33, %v597_v36  ;;  %v679_v52 = vrot.slane %v671_v42, %v2025_v32  ;;  %v394_v33 = vld [vmem:[%s348_s7] sm:$0x1]  ;;  %v396_v35 = vld [vmem:[%s348_s7 + $0x2] sm:$0x1]  ;;  %v397_v36 = vld [vmem:[%s348_s7 + $0x3] sm:$0x1] }
  0x88   : > { %v686_v1 = vrot.slane %v672_v57, %v2025_v32  ;;  %v400_v39 = vld [vmem:[%s348_s7 + $0x6] sm:$0x1]  ;;  %v428_v49 = vshrl.u32 %v396_v35, 16  ;;  %v421_v57 = vpack.i.b16 %v395_v34, %v394_v33 }
  0x89   : > { %v627_v46 = vrot.slane %v619_v40, %v2025_v32  ;;  %v687_v48 = vcombine.low %v585_v41, %v601_v43  ;;  %v688_v51 = vcombine.high %v585_v41, %v601_v43  ;;  %v634_v56 = vrot.slane %v620_v44, %v2025_v32  ;;  %v401_v40 = vld [vmem:[%s348_s7 + $0x7] sm:$0x1] }
  0x8a   : > { %v1957_v41 = vmov 1966171168   ;;  %v422_v44 = vshrl.u32 %v394_v33, 16 }
  0x8b   : > { %v635_v50 = vcombine.low %v611_v45, %v627_v46  ;;  %v695_v53 = vrot.slane %v687_v48, %v2025_v32  ;;  %v636_v55 = vcombine.high %v611_v45, %v627_v46  ;;  %v702_v62 = vrot.slane %v688_v51, %v2025_v32 }
  0x8c   : > { %v651_v0 = vcombine.low %v618_v59, %v634_v56  ;;  %v652_v5 = vcombine.high %v618_v59, %v634_v56  ;;  %v1104_v42 = vunpack.c.l.s4 %v1957_v41  ;;  %v423_v48 = vshrl.u32 %v395_v34, 16 }
  0x8d   : > { %v643_v54 = vrot.slane %v635_v50, %v2030_v47  ;;  %v703_v58 = vcombine.low %v679_v52, %v695_v53  ;;  %v704_v61 = vcombine.high %v679_v52, %v695_v53  ;;  %v650_v63 = vrot.slane %v636_v55, %v2030_v47 }
  0x8e   : > { %v719_v3 = vcombine.low %v686_v1, %v702_v62  ;;  %v659_v4 = vrot.slane %v651_v0, %v2030_v47  ;;  %v720_v7 = vcombine.high %v686_v1, %v702_v62  ;;  %v666_v8 = vrot.slane %v652_v5, %v2030_v47 }
  0x8f   : > { %739 = vxpose.xlu0.c.b16.start.end [1/1] (short) (narrow) %v643_v54, 16  ;;  %v711_v60 = vrot.slane %v703_v58, %v2030_v47  ;;  %v718_v2 = vrot.slane %v704_v61, %v2030_v47  ;;  %v667_v12 = vcombine.high %v643_v54, %v1955_v11  ;;  %v668_v14 = vcombine.high %v650_v63, %v1955_v11 }
  0x90   : > { %v727_v6 = vrot.slane %v719_v3, %v2030_v47  ;;  %v734_v10 = vrot.slane %v720_v7, %v2030_v47  ;;  %v669_v16 = vcombine.high %v659_v4, %v1955_v11  ;;  %v670_v18 = vcombine.high %v666_v8, %v1955_v11 }
  0x91   : > { %755 = vxpose.xlu1.c.b16.start.end [1/1] (short) (narrow) %v711_v60, 16  ;;  %v735_v13 = vcombine.high %v711_v60, %v1955_v11  ;;  %v736_v15 = vcombine.high %v718_v2, %v1955_v11  ;;  %v429_v50 = vshrl.u32 %v397_v36, 16  ;;  %v434_v51 = vshrl.u32 %v398_v37, 16 }
  0x92   : > { %v737_v17 = vcombine.high %v727_v6, %v1955_v11  ;;  %v738_v19 = vcombine.high %v734_v10, %v1955_v11  ;;  %v435_v52 = vshrl.u32 %v399_v38, 16  ;;  %v440_v53 = vshrl.u32 %v400_v39, 16 }
  0x93   : > { %803 = vxpose.xlu0.c.b16.start.end [1/1] (short) (narrow) %v650_v63, 16  ;;  %v441_v54 = vshrl.u32 %v401_v40, 16  ;;  %v1105_v58 = vunpack.c.0.s8 %v1104_v42  ;;  %v427_v61 = vpack.i.b16 %v397_v36, %v396_v35  ;;  %v433_v62 = vpack.i.b16 %v399_v38, %v398_v37 }
  0x94   : > { %v439_v63 = vpack.i.b16 %v401_v40, %v400_v39  ;;  %v424_v3 = vpack.i.b16 %v423_v48, %v422_v44  ;;  %v430_v5 = vpack.i.b16 %v429_v50, %v428_v49  ;;  %v1958_v48 = vmov -1e+30   ;;  %v1826_v50 = vld [vmem:[%s373_s10] ss:$0 sm:$0xff] }
  0x95   : > { %819 = vxpose.xlu1.c.b16.start.end [1/1] (short) (narrow) %v718_v2, 16  ;;  %v442_v7 = vpack.i.b16 %v441_v54, %v440_v53  ;;  %387 = vst.msk [vmem:[#allocation2] sm:$0xff] %vm386_vm2, %v1958_v48  ;;  %388 = vst.msk [vmem:[#allocation2 + $0x8] sm:$0xff] %vm386_vm2, %v1958_v48 }
  0x97   : > { %867 = vxpose.xlu0.c.b16.start.end [1/1] (short) (narrow) %v659_v4, 16 }
  0x99   : > { %883 = vxpose.xlu1.c.b16.start.end [1/1] (short) (narrow) %v727_v6, 16  ;;  %v436_v6 = vpack.i.b16 %v435_v52, %v434_v51 }
  0x9b   : > { %931 = vxpose.xlu0.c.b16.start.end [1/1] (short) (narrow) %v666_v8, 16 }
  0x9d   : > { %947 = vxpose.xlu1.c.b16.start.end [1/1] (short) (narrow) %v734_v10, 16 }
  0x9f   : > { %771 = vxpose.xlu0.c.b16.start.end [1/1] (short) (narrow) %v667_v12, 16  ;;  %v2064_v12 = vsub.s32 %v1105_v58, %v2022_v20 }
  0xa1   : > { %787 = vxpose.xlu1.c.b16.start.end [1/1] (short) (narrow) %v735_v13, 16 }
  0xa3   : > { %835 = vxpose.xlu0.c.b16.start.end [1/1] (short) (narrow) %v668_v14, 16 }
  0xa5   : > { %851 = vxpose.xlu1.c.b16.start.end [1/1] (short) (narrow) %v736_v15, 16 }
  0xa7   : > { %899 = vxpose.xlu0.c.b16.start.end [1/1] (short) (narrow) %v669_v16, 16  ;;  %v1101_v16 = vcombine.low %v421_v57, %v427_v61 }
  0xa9   : > { %915 = vxpose.xlu1.c.b16.start.end [1/1] (short) (narrow) %v737_v17, 16  ;;  %v1102_v17 = vcombine.low %v433_v62, %v439_v63 }
  0xab   : > { %963 = vxpose.xlu0.c.b16.start.end [1/1] (short) (narrow) %v670_v18, 16 }
  0xad   : > { %979 = vxpose.xlu1.c.b16.start.end [1/1] (short) (narrow) %v738_v19, 16 }
  0xb1   : > { %1913 = vset.pattern.permute.xlu1 %v1955_v11 }
  0xb4   : > { %1912 = vset.pattern.permute.xlu0 %v1955_v11 }
  0xf5   : > { %v747_v21 = vpop.trf.xlu0 }
  0xf7   : > { %v763_v22 = vpop.trf.xlu1 }
  0xf9   : > { %v811_v23 = vpop.trf.xlu0 }
  0xfa   : > { %v995_v55 = vcombine.low %v747_v21, %v811_v23  ;;  %v1169_v23 = vcombine.low %v424_v3, %v430_v5 }
  0xfb   : > { %v827_v24 = vpop.trf.xlu1 }
  0xfc   : > { %v1044_v0 = vcombine.low %v763_v22, %v827_v24  ;;  %v1002_v8 = vrot.slane %v995_v55, %v2025_v32  ;;  %v1170_v24 = vcombine.low %v436_v6, %v442_v7  ;;  %v1177_v33 = vrot.slane %v1169_v23, %v2064_v12 }
  0xfd   : > { %v875_v25 = vpop.trf.xlu0 }
  0xfe   : > { %v1051_v18 = vrot.slane %v1044_v0, %v2025_v32  ;;  %v1184_v34 = vrot.slane %v1170_v24, %v2064_v12  ;;  %v2107_v0 = vld [vmem:[#allocation2] sm:$0xff] }
  0xff   : > { %v891_v26 = vpop.trf.xlu1 }
 0x100   : > { %v1185_v40 = vcombine.low %v1177_v33, %v1184_v34 }
 0x101   : > { %v939_v27 = vpop.trf.xlu0 }
 0x102   : > { %v1011_v59 = vcombine.low %v875_v25, %v939_v27 }
 0x103   : > { %v955_v28 = vpop.trf.xlu1 }
 0x104   : > { %v1060_v10 = vcombine.low %v891_v26, %v955_v28  ;;  %v1018_v13 = vrot.slane %v1011_v59, %v2025_v32  ;;  %v1109_v28 = vrot.slane %v1101_v16, %v2064_v12  ;;  %v415_v16 = vld [vmem:[%s366_s13 + $0x5] sm:$0x1] }
 0x105   : > { %v779_v29 = vpop.trf.xlu0 }
 0x106   : > { %v1067_v25 = vrot.slane %v1060_v10, %v2025_v32  ;;  %v411_v10 = vld [vmem:[%s366_s13 + $0x1] sm:$0x1] }
 0x107   : > { %v795_v30 = vpop.trf.xlu1  ;;  %v1314_v23 = vshrl.u32 %v411_v10, 16 }
 0x109   : > { %v843_v31 = vpop.trf.xlu0 }
 0x10a   : > { %v1003_v45 = vcombine.low %v779_v29, %v843_v31  ;;  %v1116_v29 = vrot.slane %v1102_v17, %v2064_v12  ;;  %v416_v17 = vld [vmem:[%s366_s13 + $0x6] sm:$0x1] }
 0x10b   : > { %v859_v43 = vpop.trf.xlu1  ;;  %v1331_v33 = vshrl.u32 %v416_v17, 16 }
 0x10c   : > { %v1052_v56 = vcombine.low %v795_v30, %v859_v43  ;;  %v1010_v1 = vrot.slane %v1003_v45, %v2025_v32  ;;  %v1117_v38 = vcombine.low %v1109_v28, %v1116_v29  ;;  %v1326_v29 = vshrl.u32 %v415_v16, 16 }
 0x10d   : > { %v907_v46 = vpop.trf.xlu0 }
 0x10e   : > { %v1059_v11 = vrot.slane %v1052_v56, %v2025_v32  ;;  %v1027_v19 = vcombine.low %v1002_v8, %v1010_v1  ;;  %v1124_v44 = vrot.slane %v1117_v38, %v2064_v12  ;;  %v410_v8 = vld [vmem:[%s366_s13] sm:$0x1] }
 0x10f   : > { %v923_v60 = vpop.trf.xlu1 }
 0x110   : > { %v1076_v26 = vcombine.low %v1051_v18, %v1059_v11  ;;  %v1034_v31 = vrot.slane %v1027_v19, %v2030_v47  ;;  %v412_v11 = vld [vmem:[%s366_s13 + $0x2] sm:$0x1]  ;;  %v417_v19 = vld [vmem:[%s366_s13 + $0x7] sm:$0x1] }
 0x111   : > { %v971_v2 = vpop.trf.xlu0  ;;  %v1319_v24 = vshrl.u32 %v412_v11, 16  ;;  %v1332_v34 = vshrl.u32 %v417_v19, 16 }
 0x112   : > { %v1019_v4 = vcombine.low %v907_v46, %v971_v2  ;;  %v1083_v36 = vrot.slane %v1076_v26, %v2030_v47  ;;  %v1192_v46 = vrot.slane %v1185_v40, %v2064_v12  ;;  %v2109_v2 = vld [vmem:[#allocation2 + $0x8] sm:$0xff] }
 0x113   : > { %v987_v15 = vpop.trf.xlu1  ;;  %v1333_v38 = vpack.i.b16 %v1332_v34, %v1331_v33 }
 0x114   : > { %v1026_v14 = vrot.slane %v1019_v4, %v2025_v32  ;;  %v1068_v21 = vcombine.low %v923_v60, %v987_v15  ;;  %v1312_v15 = vpack.i.b16 %v411_v10, %v410_v8 }
 0x116   : > { %v1035_v22 = vcombine.low %v1018_v13, %v1026_v14  ;;  %v1075_v20 = vrot.slane %v1068_v21, %v2025_v32  ;;  %v413_v13 = vld [vmem:[%s366_s13 + $0x3] sm:$0x1]  ;;  %v414_v14 = vld [vmem:[%s366_s13 + $0x4] sm:$0x1] }
 0x117   : > { %v1318_v18 = vpack.i.b16 %v413_v13, %v412_v11  ;;  %v1324_v21 = vpack.i.b16 %v415_v16, %v414_v14  ;;  %v1325_v28 = vshrl.u32 %v414_v14, 16 }
 0x118   : > { %v1042_v27 = vrot.slane %v1035_v22, %v2030_v47  ;;  %v1084_v30 = vcombine.low %v1067_v25, %v1075_v20  ;;  %v1313_v22 = vshrl.u32 %v410_v8, 16  ;;  %v1330_v25 = vpack.i.b16 %v417_v19, %v416_v17  ;;  %v1280_v8 = vld [vmem:[#allocation3 + $0x8] sm:$0xff]  ;;  %v1914_v17 = vld [vmem:[%s2200_s4] sm:$0xff]  }
 0x119   : > { %v1334_v26 = vcombine.low %v1312_v15, %v1318_v18  ;;  %v1915_v18 = vld [vmem:[%s2200_s4 + $0x8] sm:$0xff]  }
 0x11a   : > { %v1043_v35 = vcombine.low %v1034_v31, %v1042_v27  ;;  %v1091_v37 = vrot.slane %v1084_v30, %v2030_v47  ;;  %v1315_v20 = vpack.i.b16 %v1314_v23, %v1313_v22  ;;  %v1320_v27 = vshrl.u32 %v413_v13, 16  ;;  %v1295_v22 = vld [vmem:[#allocation4 + $0x8] sm:$0xff] }
 0x11b   : > { %v1335_v30 = vcombine.low %v1324_v21, %v1330_v25  ;;  %v1342_v31 = vrot.slane %v1334_v26, %v2064_v12  ;;  %v1294_v21 = vld [vmem:[#allocation4] sm:$0xff] }
 0x11c   : > { %v1092_v39 = vcombine.low %v1083_v36, %v1091_v37  ;;  %v1097_v42 = vshrl.u32 %v1043_v35, 16  ;;  %v1327_v36 = vpack.i.b16 %v1326_v29, %v1325_v28 }
 0x11d   : > { %v1349_v37 = vrot.slane %v1335_v30, %v2064_v12 }
 0x11e   : > { %v1095_v41 = vpack.i.b16 %v1092_v39, %v1043_v35  ;;  %v1098_v43 = vshrl.u32 %v1092_v39, 16  ;;  %v1321_v35 = vpack.i.b16 %v1320_v27, %v1319_v24 }
 0x11f   : > { %v1350_v40 = vcombine.low %v1342_v31, %v1349_v37 }
 0x120   : > { %1849 = vmatpush3.bf16.msra.mxu0 %v1095_v41  ;;  %v1099_v45 = vpack.i.b16 %v1098_v43, %v1097_v42  ;;  %v1405_v39 = vcombine.low %v1315_v20, %v1321_v35  ;;  %v1406_v41 = vcombine.low %v1327_v36, %v1333_v38 }
 0x121   : > { %1860 = vmatprep.subr.bf16.mxu0 %v1954_v9  ;;  %v1357_v43 = vrot.slane %v1350_v40, %v2064_v12 }
 0x122   : > { %1855 = vmatpush3.bf16.msra.mxu1 %v1099_v45  ;;  %v1413_v42 = vrot.slane %v1405_v39, %v2064_v12 }
 0x123   : > { %1851 = vmatmul.mubr.msk.bf16.vlgmr.msra.gmra.mrb[0].mxu0 %vm391_vm1, %v1124_v44  ;;  %1866 = vmatprep.subr.bf16.mxu1 %v1954_v9  ;;  %v1420_v44 = vrot.slane %v1406_v41, %v2064_v12  ;;  %v1363_v45 = vsel %vm1361_vm4, %v1357_v43, 0 }
 0x124   : > { %1862 = vmatprep.mubr.msk.bf16.mxu0 %vm1956_vm0, %v1954_v9  ;;  %1861 = vmatpush3.bf16.msra.mxu0 %v1363_v45 }
 0x125   : > { %1857 = vmatmul.mubr.msk.bf16.vlgmr.msra.gmra.mrb[0].mxu1 %vm391_vm1, %v1192_v46  ;;  %v1421_v46 = vcombine.low %v1413_v42, %v1420_v44  ;;  %1872 = vmatprep.subr.bf16.mxu0 %v1954_v9 }
 0x126   : > { %1868 = vmatprep.mubr.msk.bf16.mxu1 %vm1956_vm0, %v1954_v9 }
 0x127   : > { %v1428_v48 = vrot.slane %v1421_v46, %v2064_v12 }
 0x1f6   : > { %v1163_v49 = vpop.f32.mrb[0].mxu0 }
 0x1f7   : > { %v1236_v51 = vmul.f32 0.25, %v1163_v49  ;;  %v1852_v52 = vpop.f32.mrb[1].mxu0  ;;  %v1433_v49 = vsel %vm1361_vm4, %v1428_v48, 0 }
 0x1f8   : > { %v1166_v53 = vpop.f32.mrb[2].mxu0  ;;  %v1230_v54 = vpop.f32.mrb[0].mxu1  ;;  %1867 = vmatpush3.bf16.msra.mxu1 %v1433_v49 }
 0x1f9   : > { %v1237_v55 = vmul.f32 0.25, %v1230_v54  ;;  %v1853_v56 = vpop.f32.mrb[3].mxu0  ;;  %v1858_v57 = vpop.f32.mrb[1].mxu1  ;;  %v2099_v58 = vadd.f32 %v1826_v50, %v1236_v51 }
 0x1fa   : > { %v1233_v59 = vpop.f32.mrb[2].mxu1 }
 0x1fb   : > { %v1859_v60 = vpop.f32.mrb[3].mxu1  ;;  %v1249_v61 = vsel %vm1248_vm3, %v2099_v58, -inf  ;;  %v2103_v62 = vadd.f32 %v1826_v50, %v1237_v55 }
 0x1fc   : > { %1250 = vmax.xlane.f32.xlu0 %v1249_v61 }
 0x1fd   : > { %v1252_v63 = vsel %vm1248_vm3, %v2103_v62, -inf }
 0x1fe   : > { %1253 = vmax.xlane.f32.xlu1 %v1252_v63 }
 0x289   : > { %v1251_v1 = vpop.xlane.xlu0 %1250 }
 0x28a   : > { %v2112_v3 = vmax.f32 %v2107_v0, %v1251_v1 }
 0x28b   : > { %v1254_v4 = vpop.xlane.xlu1 %1253 }
 0x28c   : > { %v1257_v5 = vsub.f32 %v2107_v0, %v2112_v3  ;;  %1479 = vst.msk [vmem:[#allocation2] sm:$0xff] %vm386_vm2, %v2112_v3  ;;  %v2123_v6 = vmax.f32 %v2109_v2, %v1254_v4  ;;  %1265 = vperm.xlu0 %1912, %v2112_v3   ;;  %v1279_v4 = vld [vmem:[#allocation3] sm:$0xff] }
 0x28e   : > { %v1258_v7 = vsub.f32 %v2109_v2, %v2123_v6  ;;  %1480 = vst.msk [vmem:[#allocation2 + $0x8] sm:$0xff] %vm386_vm2, %v2123_v6  ;;  %1270 = vperm.xlu1 %1913, %v2123_v6  }
 0x30b   : > { %v1266_v50 = vpop.permute.xlu0 %1265 }
 0x30c   : > { %v1273_v51 = vsub.f32 %v2099_v58, %v1266_v50  ;;  %v1259_v58 = vmul.f32 1.442695, %v1257_v5 }
 0x30d   : > { %v1271_v52 = vpop.permute.xlu1 %1270 }
 0x30e   : > { %v1275_v53 = vmul.f32 1.442695, %v1273_v51  ;;  %v1274_v54 = vsub.f32 %v2103_v62, %v1271_v52  ;;  %v1261_v62 = vmul.f32 1.442695, %v1258_v7 }
 0x310   : > { %1916 = vpow2.f32 %v1275_v53  ;;  %v1277_v55 = vmul.f32 1.442695, %v1274_v54 }
 0x312   : > { %1918 = vpow2.f32 %v1277_v55 }
 0x313   : > { %1920 = vpow2.f32 %v1259_v58 }
 0x314   : > { %1922 = vpow2.f32 %v1261_v62 }
 0x31a   : > { %v1917_v56 = vpop.eup %1916 }
 0x31b   : > { %v1283_v57 = vsel %vm1248_vm3, %v1917_v56, 0.0  ;;  %v1308_v59 = vpack.c.bf16 %v1917_v56, %v1917_v56 }
 0x31c   : > { %v1919_v60 = vpop.eup %1918  ;;  %1284 = vadd.xlane.f32.xlu1 %v1283_v57 }
 0x31d   : > { %1863 = vmatmul.mubr.msk.bf16.vlgmr.msra.gmra.mrb[4].mxu0 %vm1248_vm3, %v1308_v59  ;;  %v1286_v12 = vsel %vm1248_vm3, %v1919_v60, 0.0  ;;  %v1309_v61 = vpack.c.bf16 %v1919_v60, %v1919_v60  ;;  %v1921_v63 = vpop.eup %1920 }
 0x31e   : > { %1287 = vadd.xlane.f32.xlu0 %v1286_v12  ;;  %1876 = vmatprep.mubr.msk.bf16.mxu0 %vm1956_vm0, %v1954_v9  ;;  %v1923_v1 = vpop.eup %1922  ;;  %v1281_v0 = vmul.f32 %v1921_v63, %v1279_v4 }
 0x31f   : > { %1869 = vmatmul.mubr.msk.bf16.vlgmr.msra.gmra.mrb[4].mxu1 %vm1248_vm3, %v1309_v61  ;;  %v1282_v10 = vmul.f32 %v1923_v1, %v1280_v8  ;;  %1873 = vmatpush3.bf16.msra.mxu0 %v1914_v17 }
 0x320   : > { %1874 = vmatprep.subr.bf16.mxu0 %v1954_v9 }
 0x323   : > { %1875 = vmatpush3.bf16.msra.mxu0 %v1915_v18 }
 0x32d   : > { %1298 = vperm.xlu1 %1913, %v1921_v63  }
 0x331   : > { %1303 = vperm.xlu1 %1913, %v1923_v1  }
 0x3a9   : > { %v1285_v3 = vpop.xlane.xlu1 %1284 }
 0x3aa   : > { %v1289_v5 = vadd.f32 %v1285_v3, %v1281_v0 }
 0x3ab   : > { %v1288_v11 = vpop.xlane.xlu0 %1287 }
 0x3ac   : > { %1292 = vst.msk [vmem:[#allocation3] sm:$0xff] %vm386_vm2, %v1289_v5  ;;  %v1290_v13 = vadd.f32 %v1288_v11, %v1282_v10 }
 0x3ad   : > { %v1299_v19 = vpop.permute.xlu1 %1298 }
 0x3ae   : > { %1293 = vst.msk [vmem:[#allocation3 + $0x8] sm:$0xff] %vm386_vm2, %v1290_v13  ;;  %v1306_v24 = vmul.f32 %v1299_v19, %v1294_v21 }
 0x3b1   : > { %v1304_v23 = vpop.permute.xlu1 %1303 }
 0x3b2   : > { %v1307_v26 = vmul.f32 %v1304_v23, %v1295_v22 }
 0x3b3   : > { %v1484_v14 = vld [vmem:[#allocation3] sm:$0xff] }
 0x3b4   : > { %v1486_v2 = vmax.f32 %v1484_v14, 1e-30 }
 0x3b5   : > { %v1485_v6 = vld [vmem:[#allocation3 + $0x8] sm:$0xff] }
 0x3b6   : > { %1924 = vrcp.f32 %v1486_v2  ;;  %v1487_v7 = vmax.f32 %v1485_v6, 1e-30 }
 0x3b8   : > { %1926 = vrcp.f32 %v1487_v7 }
 0x3c0   : > { %v1925_v15 = vpop.eup %1924 }
 0x3c1   : > { %1494 = vperm.xlu1 %1913, %v1925_v15  }
 0x3c2   : > { %v1927_v16 = vpop.eup %1926 }
 0x3c3   : > { %1499 = vperm.xlu0 %1912, %v1927_v16  }
 0x3f0   : > { %v1399_v25 = vpop.f32.mrb[4].mxu0 }
 0x3f1   : > { %v1475_v20 = vadd.f32 %v1399_v25, %v1306_v24  ;;  %v1864_v27 = vpop.f32.mrb[5].mxu0 }
 0x3f2   : > { %v1402_v28 = vpop.f32.mrb[6].mxu0  ;;  %v1469_v29 = vpop.f32.mrb[4].mxu1 }
 0x3f3   : > { %1477 = vst.msk [vmem:[#allocation4] sm:$0xff] %vm391_vm1, %v1475_v20  ;;  %v1476_v30 = vadd.f32 %v1469_v29, %v1307_v26  ;;  %v1865_v31 = vpop.f32.mrb[7].mxu0  ;;  %v1870_v33 = vpop.f32.mrb[5].mxu1 }
 0x3f4   : > { %v1472_v34 = vpop.f32.mrb[6].mxu1 }
 0x3f5   : > { %1478 = vst.msk [vmem:[#allocation4 + $0x8] sm:$0xff] %vm391_vm1, %v1476_v30  ;;  %v1871_v35 = vpop.f32.mrb[7].mxu1 }
 0x3fa   : > { %v1488_v37 = vld [vmem:[#allocation4] sm:$0xff] }
 0x3fc   : > { %v1489_v40 = vld [vmem:[#allocation4 + $0x8] sm:$0xff] }
 0x440   : > { %v1495_v36 = vpop.permute.xlu1 %1494 }
 0x441   : > { %v1502_v38 = vmul.f32 %v1495_v36, %v1488_v37 }
 0x442   : > { %v1500_v39 = vpop.permute.xlu0 %1499 }
 0x443   : > { %v1504_v41 = vcombine.high %v1502_v38, %v1954_v9  ;;  %v1503_v42 = vmul.f32 %v1500_v39, %v1489_v40  ;;  %v1511_v43 = vrot.slane %v1502_v38, %v2025_v32 }
 0x445   : > { %v1519_v44 = vcombine.high %v1503_v42, %v1954_v9  ;;  %v1526_v45 = vrot.slane %v1503_v42, %v2025_v32  ;;  %v1518_v46 = vrot.slane %v1504_v41, %v2025_v32 }
 0x447   : > { %v1533_v48 = vrot.slane %v1519_v44, %v2025_v32  ;;  %v1534_v49 = vcombine.low %v1511_v43, %v1526_v45  ;;  %v1535_v50 = vcombine.high %v1511_v43, %v1526_v45 }
 0x449   : > { %v1542_v51 = vrot.slane %v1534_v49, %v2030_v47  ;;  %v1549_v52 = vrot.slane %v1535_v50, %v2030_v47  ;;  %v1550_v53 = vcombine.low %v1518_v46, %v1533_v48  ;;  %v1551_v54 = vcombine.high %v1518_v46, %v1533_v48 }
 0x44b   : > { %v1558_v55 = vrot.slane %v1550_v53, %v2030_v47  ;;  %v1565_v56 = vrot.slane %v1551_v54, %v2030_v47  ;;  %v1570_v57 = vcombine.low %v1542_v51, %v1549_v52  ;;  %v1829_v9 = vcombine.high %v1542_v51, %v1549_v52 }
 0x44d   : > { %v1586_v59 = vcombine.low %v1558_v55, %v1565_v56  ;;  %v1830_v60 = vcombine.high %v1558_v55, %v1565_v56  ;;  %v1577_v12 = vrot.slane %v1570_v57, %v2025_v32  ;;  %v1585_v61 = vrot.slane %v1829_v9, %v2025_v32 }
 0x44f   : > { %v1593_v58 = vrot.slane %v1586_v59, %v2025_v32  ;;  %v1601_v62 = vrot.slane %v1830_v60, %v2025_v32  ;;  %v1602_v63 = vcombine.low %v1577_v12, %v1585_v61  ;;  %v1831_v32 = vld [vmem:[%s2201_s5] ss:$0 sm:$0xff] }
 0x451   : > { %v1610_v1 = vcombine.low %v1593_v58, %v1601_v62  ;;  %v1609_v4 = vrot.slane %v1602_v63, %v2030_v47 }
 0x453   : > { %v1617_v8 = vrot.slane %v1610_v1, %v2030_v47 }
 0x455   : > { %v1619_v0 = vcombine.high %v1609_v4, %v1617_v8  ;;  %v1618_v3 = vcombine.low %v1609_v4, %v1617_v8 }
 0x457   : > { %1621 = vrot.lane.b32.xlu1 %v1619_v0, %s1959_s18 }
 0x4c9   : > { %v1622_v5 = vpop.permute.xlu1 %1621 }
 0x4ca   : > { %v1624_v10 = vsel %vm391_vm1, %v1618_v3, %v1622_v5 }
 0x4cb   : > { %v1625_v11 = vpack.c.bf16 %v1624_v10, %v1624_v10 }
 0x4cd   : > { %1877 = vmatmul.mubr.msk.bf16.vlgmr.msra.gmra.mrb[8].mxu0 %vm1649_vm5, %v1625_v11 }
 0x5a0   : > { %v1687_v13 = vpop.f32.mrb[8].mxu0 }
 0x5a1   : > { %v1688_v14 = vadd.f32 %v1831_v32, %v1687_v13  ;;  %v1878_v2 = vpop.f32.mrb[9].mxu0 }
 0x5a2   : > { %v1690_v47 = vpop.f32.mrb[10].mxu0 }
 0x5a3   : > { %v1693_v6 = vpack.c.bf16 %v1688_v14, %v1688_v14  ;;  %v1879_v7 = vpop.f32.mrb[11].mxu0 }
 0x5a5   : > { %1695 = vst.msk [vmem:[%s380_s28] sm:$0xf] %vm1694_vm6, %v1693_v6 }
 0x5a6 PF: > { %s16_s23 = sadd.s32 1, %s1950_s23   ;;  %s2203_s21 = smov %s1946_s22 }
 0x5a7   : > { %p13_p5 = scmp.ge.s32.totalorder %s16_s23, 4   ;;  %s2204_s22 = smov %s2206_s24 }
 0x5a9   :  { %15 = sbr.rel (!%p13_p5) target bundleno = 2 (0x2), region = 91 }

// kernel: sentiment_forward.19
= control target key start
LH: loop header
LB: loop body
LE: loop exit
PB: predicated region body
PF: predicated region fallthrough
CT: control target
= control target key end

     0   :  { %v200_v0 = vmov 0.0   ;;  %vm201_vm0 = vmmov 0   ;;  %vm45_vm1 = vcmask 261120   ;;  %s258_s1 = inlined_call_operand.vmem [shape: bf16[32,32], index: 1, kind: input, shape index: {}]   ;;  %s259_s0 = inlined_call_operand.vmem [shape: bf16[8,32], index: 0, kind: input, shape index: {}]   ;;  %s260_s3 = inlined_call_operand.vmem [shape: bf16[32,128], index: 3, kind: input, shape index: {}]   ;;  %s261_s2 = inlined_call_operand.vmem [shape: f32[1,32], index: 2, kind: input, shape index: {}]   ;;  %s262_s4 = inlined_call_operand.vmem [shape: f32[1,128], index: 4, kind: input, shape index: {}]   ;;  %s263_s5 = inlined_call_operand.vmem [shape: f32[8,128], index: 5, kind: output, shape index: {}]  }
   0x1   :  { %176 = vmatprep.subr.bf16.mxu0 %v200_v0  ;;  %v194_v1 = vld [vmem:[%s258_s1] sm:$0xff]   ;;  %180 = vmatprep.mubr.msk.bf16.mxu0 %vm201_vm0, %v200_v0  ;;  %v195_v2 = vld [vmem:[%s258_s1 + $0x8] sm:$0xff]  }
   0x2   :  { %184 = vmatprep.subr.bf16.mxu1 %v200_v0  ;;  %188 = vmatprep.mubr.msk.bf16.mxu1 %vm201_vm0, %v200_v0  ;;  %v21_v3 = vld [vmem:[%s259_s0] sm:$0xf]  ;;  %v197_v5 = vld [vmem:[%s260_s3 + $0x8] sm:$0xff]  }
   0x3   :  { %177 = vmatpush3.bf16.msra.mxu0 %v194_v1  ;;  %v196_v4 = vld [vmem:[%s260_s3] sm:$0xff]  }
   0x4   :  { %178 = vmatprep.subr.bf16.mxu0 %v200_v0  ;;  %185 = vmatpush3.bf16.msra.mxu1 %v196_v4  ;;  %v162_v6 = vld [vmem:[%s261_s2] ss:$0 sm:$0xff] }
   0x5   :  { %186 = vmatprep.subr.bf16.mxu1 %v200_v0  ;;  %v166_v14 = vld [vmem:[%s262_s4] ss:$0 sm:$0xff] }
   0x7   :  { %179 = vmatpush3.bf16.msra.mxu0 %v195_v2 }
   0x8   :  { %187 = vmatpush3.bf16.msra.mxu1 %v197_v5 }
   0xa   :  { %181 = vmatmul.mubr.msk.bf16.vlgmr.msra.gmra.mrb[0].mxu0 %vm45_vm1, %v21_v3 }
  0xdd   :  { %v83_v7 = vpop.f32.mrb[0].mxu0 }
  0xde   :  { %v84_v8 = vadd.f32 %v162_v6, %v83_v7  ;;  %v182_v9 = vpop.f32.mrb[1].mxu0 }
  0xdf   :  { %v86_v10 = vpop.f32.mrb[2].mxu0 }
  0xe0   :  { %198 = vtanh.f32 %v84_v8  ;;  %v183_v11 = vpop.f32.mrb[3].mxu0 }
  0xea   :  { %v199_v12 = vpop.eup %198 }
  0xeb   :  { %v90_v13 = vpack.c.bf16 %v199_v12, %v199_v12 }
  0xed   :  { %189 = vmatmul.mubr.msk.bf16.vlgmr.msra.gmra.mrb[0].mxu1 %vm45_vm1, %v90_v13 }
 0x1c0   :  { %v151_v15 = vpop.f32.mrb[0].mxu1 }
 0x1c1   :  { %v152_v16 = vadd.f32 %v166_v14, %v151_v15  ;;  %v190_v17 = vpop.f32.mrb[1].mxu1 }
 0x1c2   :  { %v154_v18 = vpop.f32.mrb[2].mxu1 }
 0x1c3   :  { %157 = vst [vmem:[%s263_s5] sm:$0xff] %v152_v16  ;;  %v191_v19 = vpop.f32.mrb[3].mxu1 }

</bundles_post_ra>
